<compile_context>
chip_gen: v5e
topology: v5e:2x2
jax: 0.10.0
libtpu: 0.0.40
codegen_flags: <defaults>
</compile_context>

<pallas_src>
import jax
import jax.numpy as jnp
from jax.experimental import pallas as pl
from jax.experimental.pallas import tpu as pltpu

LANE = 128
NEG_MASK = -1e30  # softmax mask for padded class lanes


def _round_up(n, m):
    return (n + m - 1) // m * m


# ----------------------------- the fused kernel ----------------------------- #

def _mtae_kernel(
    # runtime scalar (SMEM)
    alpha_ref,
    # batch tile + encoder params
    x_ref,
    w0_ref, b0_ref, adj1t_ref,
    w1_ref, b1_ref, adj2t_ref,
    w2_ref, b2_ref, adj3t_ref,
    w3_ref, b3_ref,
    # decoder params
    adj3it_ref, wd1_ref, bd1_ref,
    adj2it_ref, wd2_ref, bd2_ref,
    adj1it_ref, wd3_ref, bd3_ref,
    # predictor params
    wp1_ref, bp1_ref, wp2_ref, bp2_ref,
    # discriminator params (BatchNorm already folded into wq1/bq1)
    wq1_ref, bq1_ref, wq2_ref, bq2_ref,
    # outputs
    rec_ref, pred_ref, dom_ref,
):
    def leaky(h):                                   # nn.LeakyReLU(0.2)
        return jnp.where(h > 0, h, 0.2 * h)

    def lin(h, w_ref, b_ref):
        # bf16 x bf16 MXU matmul with f32 accumulation; bias add in f32.
        return jnp.dot(h.astype(jnp.bfloat16), w_ref[...],
                       preferred_element_type=jnp.float32) + b_ref[...]

    def adj_mm(h, a_ref):
        # (adj @ h.T).T  ==  h @ adj.T   (adj.T is what lives in a_ref)
        return jnp.dot(h.astype(jnp.bfloat16), a_ref[...],
                       preferred_element_type=jnp.float32)

    x = x_ref[...]                                  # (TB, Gp) bf16

    # ----- Encoder: (Linear + LeakyReLU [+ Dropout=id]) interleaved with adj matmuls -----
    h = leaky(lin(x, w0_ref, b0_ref))               # (TB, T1p)
    h = adj_mm(h, adj1t_ref)
    h = leaky(lin(h, w1_ref, b1_ref))               # (TB, T2p)
    h = adj_mm(h, adj2t_ref)
    h = leaky(lin(h, w2_ref, b2_ref))               # (TB, T3p)
    h = adj_mm(h, adj3t_ref)
    emb = leaky(lin(h, w3_ref, b3_ref))             # (TB, Hp)

    # ----- Decoder -----
    z = adj_mm(emb, adj3it_ref)                     # (TB, Hp)
    z = leaky(lin(z, wd1_ref, bd1_ref))             # (TB, T3p)
    z = adj_mm(z, adj2it_ref)
    z = leaky(lin(z, wd2_ref, bd2_ref))             # (TB, T2p)
    z = adj_mm(z, adj1it_ref)
    rec_ref[...] = leaky(lin(z, wd3_ref, bd3_ref))  # (TB, T1p)

    # ----- Predictor: Linear + LeakyReLU -> Linear -> Softmax(dim=1) -----
    p = leaky(lin(emb, wp1_ref, bp1_ref))           # (TB, 128)
    logits = lin(p, wp2_ref, bp2_ref)               # (TB, Cp)   padded lanes biased to -1e30
    m = jnp.max(logits, axis=-1, keepdims=True)
    e = jnp.exp(logits - m)                         # padded lanes underflow to exactly 0
    denom = jnp.sum(e, axis=-1, keepdims=True)
    pred_ref[...] = e * pl.reciprocal(denom, approx=True)

    # ----- GRL (forward: emb * alpha) + Discriminator (BN folded into wq1/bq1) -----
    alpha = alpha_ref[0]
    d = adj_mm(emb, wq1_ref) * alpha + bq1_ref[...]  # alpha*(emb@W)+b == (alpha*emb)@W + b
    d = leaky(d)
    logit = lin(d, wq2_ref, bq2_ref)                # (TB, 128); real logit in lane 0
    dom_ref[...] = 1.0 / (1.0 + jnp.exp(-logit))


# --------------------------- host-side param prep --------------------------- #

def prepare_params(raw):
    """Fold BatchNorm(eval), zero-pad every dim to a multiple of 128, cast matmul
    operands to bf16 (biases stay f32). Returns the padded param dict + logical dims."""

    def pad_w(a):                                   # weights / adjacency -> bf16, both dims padded
        r, c = a.shape
        out = jnp.zeros((_round_up(r, LANE), _round_up(c, LANE)), jnp.float32)
        out = out.at[:r, :c].set(a.astype(jnp.float32))
        return out.astype(jnp.bfloat16)

    def pad_b(a, fill=0.0):                         # bias (1, out) -> f32, out dim padded
        c = a.shape[1]
        out = jnp.full((1, _round_up(c, LANE)), fill, jnp.float32)
        return out.at[:, :c].set(a.astype(jnp.float32))

    # BatchNorm1d eval (running_mean=0, running_var=1) fold into discriminator layer 1.
    scale = raw["bn_gamma"] / jnp.sqrt(1.0 + 1e-5)          # (1, 64)
    wq1_f = raw["wq1"] * scale                              # (hidden, 64)
    bq1_f = raw["bq1"] * scale + raw["bn_beta"]             # (1, 64)

    p = {}
    for k in ["w0", "w1", "w2", "w3", "wd1", "wd2", "wd3", "wp1", "wp2", "wq2",
              "adj1_t", "adj2_t", "adj3_t", "adj1_inv_t", "adj2_inv_t", "adj3_inv_t"]:
        p[k] = pad_w(raw[k])
    p["wq1"] = pad_w(wq1_f)

    for k in ["b0", "b1", "b2", "b3", "bd1", "bd2", "bd3", "bp1", "bq2"]:
        p[k] = pad_b(raw[k])
    p["bq1"] = pad_b(bq1_f)
    p["bp2"] = pad_b(raw["bp2"], fill=NEG_MASK)     # mask padded softmax classes

    p["dims"] = {
        "gene": raw["w0"].shape[0],
        "t1": raw["wd3"].shape[1],
        "c": raw["wp2"].shape[1],
    }
    return p


# ------------------------------ python wrapper ------------------------------ #

_WEIGHT_ORDER = [
    "w0", "b0", "adj1_t", "w1", "b1", "adj2_t", "w2", "b2", "adj3_t", "w3", "b3",
    "adj3_inv_t", "wd1", "bd1", "adj2_inv_t", "wd2", "bd2", "adj1_inv_t", "wd3", "bd3",
    "wp1", "bp1", "wp2", "bp2",
    "wq1", "bq1", "wq2", "bq2",
]


def multi_task_autoencoder_forward(prep, x, alpha=1.0, block_batch=256):
    """Returns (rec, pred, domain) exactly like MultiTaskAutoEncoder.forward (eval mode)."""
    dims = prep["dims"]
    B, G = x.shape
    gene_p = prep["w0"].shape[0]
    t1_p = prep["wd3"].shape[1]
    c_p = prep["wp2"].shape[1]
    dom_p = prep["wq2"].shape[1]

    # Batch tile: >=128 rows in production keeps the MXU full; for tiny batches use a
    # single 8-aligned tile instead of padding all the way up.
    tb = block_batch if B >= block_batch else _round_up(max(B, 8), 8)
    b_p = _round_up(B, tb)
    grid = (b_p // tb,)

    # x is the only array re-fetched per grid step; pad + store it as bf16 to halve the
    # per-step HBM->VMEM DMA.  (It would be cast to bf16 at the first dot anyway.)
    x_pad = (jnp.zeros((b_p, gene_p), jnp.float32)
             .at[:B, :G].set(x.astype(jnp.float32))).astype(jnp.bfloat16)
    alpha_arr = jnp.asarray([alpha], dtype=jnp.float32)

    smem_spec = pl.BlockSpec(memory_space=pltpu.MemorySpace.SMEM)
    x_spec = pl.BlockSpec((tb, gene_p), lambda i: (i, 0))
    # Weights / adjacency / biases: full-array blocks with a constant index_map so they are
    # DMA'd once and stay VMEM-resident across all batch tiles.
    w_specs = [pl.BlockSpec(prep[k].shape, lambda i: (0, 0)) for k in _WEIGHT_ORDER]

    out_shape = (
        jax.ShapeDtypeStruct((b_p, t1_p), jnp.float32),   # rec (padded, lane-dense)
        jax.ShapeDtypeStruct((b_p, c_p), jnp.float32),    # pred (padded, lane-dense)
        jax.ShapeDtypeStruct((b_p, dom_p), jnp.float32),  # domain (padded, lane-dense)
    )
    out_specs = (
        pl.BlockSpec((tb, t1_p), lambda i: (i, 0)),
        pl.BlockSpec((tb, c_p), lambda i: (i, 0)),
        pl.BlockSpec((tb, dom_p), lambda i: (i, 0)),
    )

    fn = pl.pallas_call(
        _mtae_kernel,
        out_shape=out_shape,
        grid=grid,
        in_specs=[smem_spec, x_spec] + w_specs,
        out_specs=out_specs,
        compiler_params=pltpu.CompilerParams(
            dimension_semantics=("parallel",),
        ),
    )
    rec_p, pred_p, dom_full = fn(alpha_arr, x_pad, *[prep[k] for k in _WEIGHT_ORDER])

    rec = rec_p[:B, :dims["t1"]]
    pred = pred_p[:B, :dims["c"]]
    domain = dom_full[:B, :1]
    return rec, pred, domain


# --------------------------- deterministic params --------------------------- #

def init_params(key, *, gene_num, t1, t2, t3, hidden, celltype_num, head_dim=64):
    keys = iter(jax.random.split(key, 64))

    def linear(in_f, out_f, positive=False):
        w = jax.random.normal(next(keys), (in_f, out_f), jnp.float32) / jnp.sqrt(in_f)
        b = jax.random.normal(next(keys), (1, out_f), jnp.float32) * 0.01
        if positive:  # "Constraining decoder to positive weights"
            w = jnp.abs(w)
        return w, b

    def adj(n):
        return jnp.eye(n, dtype=jnp.float32) + 0.05 * jax.random.normal(
            next(keys), (n, n), jnp.float32)

    p = {}
    # encoder
    p["w0"], p["b0"] = linear(gene_num, t1)
    p["w1"], p["b1"] = linear(t1, t2)
    p["w2"], p["b2"] = linear(t2, t3)
    p["w3"], p["b3"] = linear(t3, hidden)
    p["adj1_t"] = adj(t1).T
    p["adj2_t"] = adj(t2).T
    p["adj3_t"] = adj(t3).T
    # decoder (dec_layer1 / dec_layer2 are positivity-constrained)
    p["wd1"], p["bd1"] = linear(hidden, t3, positive=True)
    p["wd2"], p["bd2"] = linear(t3, t2, positive=True)
    p["wd3"], p["bd3"] = linear(t2, t1)
    p["adj3_inv_t"] = adj(hidden).T
    p["adj2_inv_t"] = adj(t3).T
    p["adj1_inv_t"] = adj(t2).T
    # predictor (latent_dim == hidden)
    p["wp1"], p["bp1"] = linear(hidden, head_dim)
    p["wp2"], p["bp2"] = linear(head_dim, celltype_num)
    # discriminator
    p["wq1"], p["bq1"] = linear(hidden, head_dim)
    p["bn_gamma"] = jnp.ones((1, head_dim), jnp.float32)
    p["bn_beta"] = jnp.zeros((1, head_dim), jnp.float32)
    p["wq2"], p["bq2"] = linear(head_dim, 1)
    return p


# ----------------------------------- main ----------------------------------- #

if __name__ == "__main__":
    # small, shape-consistent config
    B, GENE, T1, T2, T3, HID, CTYPE = 8, 64, 48, 32, 24, 16, 4

    key = jax.random.PRNGKey(0)
    k_x, k_p = jax.random.split(key)

    x = jax.random.normal(k_x, (B, GENE), jnp.float32)
    raw_params = init_params(k_p, gene_num=GENE, t1=T1, t2=T2, t3=T3,
                             hidden=HID, celltype_num=CTYPE)
    params = prepare_params(raw_params)

    rec, pred, domain = multi_task_autoencoder_forward(params, x, alpha=1.0)
    jax.block_until_ready((rec, pred, domain))

    assert rec.shape == (B, T1)
    assert pred.shape == (B, CTYPE)
    assert domain.shape == (B, 1)
    assert bool(jnp.all(jnp.isfinite(rec)))
    # softmax rows sum to ~1 (approx reciprocal), sigmoid in [0, 1]
    assert bool(jnp.all(jnp.abs(jnp.sum(pred, axis=1) - 1.0) < 5e-3))
    assert bool(jnp.all((domain >= 0.0) & (domain <= 1.0)))

    print("KERNEL_OK")
</pallas_src>

<mosaic_0001>
module attributes {stable_mosaic.version = 11 : i64} {
  func.func @_mtae_kernel(%arg0: i32, %arg1: memref<1xf32, #tpu.memory_space<smem>>, %arg2: memref<8x128xbf16, #tpu.memory_space<vmem>>, %arg3: memref<128x128xbf16, #tpu.memory_space<vmem>>, %arg4: memref<1x128xf32, #tpu.memory_space<vmem>>, %arg5: memref<128x128xbf16, #tpu.memory_space<vmem>>, %arg6: memref<128x128xbf16, #tpu.memory_space<vmem>>, %arg7: memref<1x128xf32, #tpu.memory_space<vmem>>, %arg8: memref<128x128xbf16, #tpu.memory_space<vmem>>, %arg9: memref<128x128xbf16, #tpu.memory_space<vmem>>, %arg10: memref<1x128xf32, #tpu.memory_space<vmem>>, %arg11: memref<128x128xbf16, #tpu.memory_space<vmem>>, %arg12: memref<128x128xbf16, #tpu.memory_space<vmem>>, %arg13: memref<1x128xf32, #tpu.memory_space<vmem>>, %arg14: memref<128x128xbf16, #tpu.memory_space<vmem>>, %arg15: memref<128x128xbf16, #tpu.memory_space<vmem>>, %arg16: memref<1x128xf32, #tpu.memory_space<vmem>>, %arg17: memref<128x128xbf16, #tpu.memory_space<vmem>>, %arg18: memref<128x128xbf16, #tpu.memory_space<vmem>>, %arg19: memref<1x128xf32, #tpu.memory_space<vmem>>, %arg20: memref<128x128xbf16, #tpu.memory_space<vmem>>, %arg21: memref<128x128xbf16, #tpu.memory_space<vmem>>, %arg22: memref<1x128xf32, #tpu.memory_space<vmem>>, %arg23: memref<128x128xbf16, #tpu.memory_space<vmem>>, %arg24: memref<1x128xf32, #tpu.memory_space<vmem>>, %arg25: memref<128x128xbf16, #tpu.memory_space<vmem>>, %arg26: memref<1x128xf32, #tpu.memory_space<vmem>>, %arg27: memref<128x128xbf16, #tpu.memory_space<vmem>>, %arg28: memref<1x128xf32, #tpu.memory_space<vmem>>, %arg29: memref<128x128xbf16, #tpu.memory_space<vmem>>, %arg30: memref<1x128xf32, #tpu.memory_space<vmem>>, %arg31: memref<8x128xf32, #tpu.memory_space<vmem>>, %arg32: memref<8x128xf32, #tpu.memory_space<vmem>>, %arg33: memref<8x128xf32, #tpu.memory_space<vmem>>) attributes {dimension_semantics = [#tpu.dimension_semantics<parallel>], iteration_bounds = array<i64: 1>, scalar_prefetch = 0 : i64, scratch_operands = 0 : i64, tpu.core_type = #tpu.core_type<tc>, window_params = [{transform_indices = @transform_0, window_bounds = array<i64: 1>}, {transform_indices = @transform_1, window_bounds = array<i64: 8, 128>}, {pipeline_mode = #tpu.pipeline_mode<synchronous>, transform_indices = @transform_2, window_bounds = array<i64: 128, 128>}, {pipeline_mode = #tpu.pipeline_mode<synchronous>, transform_indices = @transform_3, window_bounds = array<i64: 1, 128>}, {pipeline_mode = #tpu.pipeline_mode<synchronous>, transform_indices = @transform_4, window_bounds = array<i64: 128, 128>}, {pipeline_mode = #tpu.pipeline_mode<synchronous>, transform_indices = @transform_5, window_bounds = array<i64: 128, 128>}, {pipeline_mode = #tpu.pipeline_mode<synchronous>, transform_indices = @transform_6, window_bounds = array<i64: 1, 128>}, {pipeline_mode = #tpu.pipeline_mode<synchronous>, transform_indices = @transform_7, window_bounds = array<i64: 128, 128>}, {pipeline_mode = #tpu.pipeline_mode<synchronous>, transform_indices = @transform_8, window_bounds = array<i64: 128, 128>}, {pipeline_mode = #tpu.pipeline_mode<synchronous>, transform_indices = @transform_9, window_bounds = array<i64: 1, 128>}, {pipeline_mode = #tpu.pipeline_mode<synchronous>, transform_indices = @transform_10, window_bounds = array<i64: 128, 128>}, {pipeline_mode = #tpu.pipeline_mode<synchronous>, transform_indices = @transform_11, window_bounds = array<i64: 128, 128>}, {pipeline_mode = #tpu.pipeline_mode<synchronous>, transform_indices = @transform_12, window_bounds = array<i64: 1, 128>}, {pipeline_mode = #tpu.pipeline_mode<synchronous>, transform_indices = @transform_13, window_bounds = array<i64: 128, 128>}, {pipeline_mode = #tpu.pipeline_mode<synchronous>, transform_indices = @transform_14, window_bounds = array<i64: 128, 128>}, {pipeline_mode = #tpu.pipeline_mode<synchronous>, transform_indices = @transform_15, window_bounds = array<i64: 1, 128>}, {pipeline_mode = #tpu.pipeline_mode<synchronous>, transform_indices = @transform_16, window_bounds = array<i64: 128, 128>}, {pipeline_mode = #tpu.pipeline_mode<synchronous>, transform_indices = @transform_17, window_bounds = array<i64: 128, 128>}, {pipeline_mode = #tpu.pipeline_mode<synchronous>, transform_indices = @transform_18, window_bounds = array<i64: 1, 128>}, {pipeline_mode = #tpu.pipeline_mode<synchronous>, transform_indices = @transform_19, window_bounds = array<i64: 128, 128>}, {pipeline_mode = #tpu.pipeline_mode<synchronous>, transform_indices = @transform_20, window_bounds = array<i64: 128, 128>}, {pipeline_mode = #tpu.pipeline_mode<synchronous>, transform_indices = @transform_21, window_bounds = array<i64: 1, 128>}, {pipeline_mode = #tpu.pipeline_mode<synchronous>, transform_indices = @transform_22, window_bounds = array<i64: 128, 128>}, {pipeline_mode = #tpu.pipeline_mode<synchronous>, transform_indices = @transform_23, window_bounds = array<i64: 1, 128>}, {pipeline_mode = #tpu.pipeline_mode<synchronous>, transform_indices = @transform_24, window_bounds = array<i64: 128, 128>}, {pipeline_mode = #tpu.pipeline_mode<synchronous>, transform_indices = @transform_25, window_bounds = array<i64: 1, 128>}, {pipeline_mode = #tpu.pipeline_mode<synchronous>, transform_indices = @transform_26, window_bounds = array<i64: 128, 128>}, {pipeline_mode = #tpu.pipeline_mode<synchronous>, transform_indices = @transform_27, window_bounds = array<i64: 1, 128>}, {pipeline_mode = #tpu.pipeline_mode<synchronous>, transform_indices = @transform_28, window_bounds = array<i64: 128, 128>}, {pipeline_mode = #tpu.pipeline_mode<synchronous>, transform_indices = @transform_29, window_bounds = array<i64: 1, 128>}, {transform_indices = @transform_30, window_bounds = array<i64: 8, 128>}, {transform_indices = @transform_31, window_bounds = array<i64: 8, 128>}, {transform_indices = @transform_32, window_bounds = array<i64: 8, 128>}]} {
    %c0 = arith.constant 0 : index
    %c0_0 = arith.constant 0 : index
    %0 = vector.load %arg2[%c0, %c0_0] : memref<8x128xbf16, #tpu.memory_space<vmem>>, vector<8x128xbf16>
    %c0_1 = arith.constant 0 : index
    %c0_2 = arith.constant 0 : index
    %1 = vector.load %arg3[%c0_1, %c0_2] : memref<128x128xbf16, #tpu.memory_space<vmem>>, vector<128x128xbf16>
    %cst = arith.constant dense<0.000000e+00> : vector<8x128xf32>
    %2 = tpu.matmul %0, %1, %cst {dimension_numbers = #tpu.dot_dimension_numbers<[1], [0], [0], [1], [0, 0, 1, 1], [], []>} : vector<8x128xbf16>, vector<128x128xbf16>, vector<8x128xf32> -> vector<8x128xf32>
    %c0_3 = arith.constant 0 : index
    %c0_4 = arith.constant 0 : index
    %3 = vector.load %arg4[%c0_3, %c0_4] : memref<1x128xf32, #tpu.memory_space<vmem>>, vector<1x128xf32>
    %4 = vector.broadcast %3 : vector<1x128xf32> to vector<8x128xf32>
    %5 = arith.addf %2, %4 : vector<8x128xf32>
    %cst_5 = arith.constant 0.000000e+00 : f32
    %6 = vector.broadcast %cst_5 : f32 to vector<8x128xf32>
    %7 = arith.cmpf ogt, %5, %6 : vector<8x128xf32>
    %cst_6 = arith.constant 2.000000e-01 : f32
    %8 = vector.broadcast %cst_6 : f32 to vector<8x128xf32>
    %9 = arith.mulf %8, %5 : vector<8x128xf32>
    %10 = arith.select %7, %5, %9 : vector<8x128xi1>, vector<8x128xf32>
    %11 = arith.truncf %10 : vector<8x128xf32> to vector<8x128xbf16>
    %c0_7 = arith.constant 0 : index
    %c0_8 = arith.constant 0 : index
    %12 = vector.load %arg5[%c0_7, %c0_8] : memref<128x128xbf16, #tpu.memory_space<vmem>>, vector<128x128xbf16>
    %cst_9 = arith.constant dense<0.000000e+00> : vector<8x128xf32>
    %13 = tpu.matmul %11, %12, %cst_9 {dimension_numbers = #tpu.dot_dimension_numbers<[1], [0], [0], [1], [0, 0, 1, 1], [], []>} : vector<8x128xbf16>, vector<128x128xbf16>, vector<8x128xf32> -> vector<8x128xf32>
    %14 = arith.truncf %13 : vector<8x128xf32> to vector<8x128xbf16>
    %c0_10 = arith.constant 0 : index
    %c0_11 = arith.constant 0 : index
    %15 = vector.load %arg6[%c0_10, %c0_11] : memref<128x128xbf16, #tpu.memory_space<vmem>>, vector<128x128xbf16>
    %cst_12 = arith.constant dense<0.000000e+00> : vector<8x128xf32>
    %16 = tpu.matmul %14, %15, %cst_12 {dimension_numbers = #tpu.dot_dimension_numbers<[1], [0], [0], [1], [0, 0, 1, 1], [], []>} : vector<8x128xbf16>, vector<128x128xbf16>, vector<8x128xf32> -> vector<8x128xf32>
    %c0_13 = arith.constant 0 : index
    %c0_14 = arith.constant 0 : index
    %17 = vector.load %arg7[%c0_13, %c0_14] : memref<1x128xf32, #tpu.memory_space<vmem>>, vector<1x128xf32>
    %18 = vector.broadcast %17 : vector<1x128xf32> to vector<8x128xf32>
    %19 = arith.addf %16, %18 : vector<8x128xf32>
    %cst_15 = arith.constant 0.000000e+00 : f32
    %20 = vector.broadcast %cst_15 : f32 to vector<8x128xf32>
    %21 = arith.cmpf ogt, %19, %20 : vector<8x128xf32>
    %cst_16 = arith.constant 2.000000e-01 : f32
    %22 = vector.broadcast %cst_16 : f32 to vector<8x128xf32>
    %23 = arith.mulf %22, %19 : vector<8x128xf32>
    %24 = arith.select %21, %19, %23 : vector<8x128xi1>, vector<8x128xf32>
    %25 = arith.truncf %24 : vector<8x128xf32> to vector<8x128xbf16>
    %c0_17 = arith.constant 0 : index
    %c0_18 = arith.constant 0 : index
    %26 = vector.load %arg8[%c0_17, %c0_18] : memref<128x128xbf16, #tpu.memory_space<vmem>>, vector<128x128xbf16>
    %cst_19 = arith.constant dense<0.000000e+00> : vector<8x128xf32>
    %27 = tpu.matmul %25, %26, %cst_19 {dimension_numbers = #tpu.dot_dimension_numbers<[1], [0], [0], [1], [0, 0, 1, 1], [], []>} : vector<8x128xbf16>, vector<128x128xbf16>, vector<8x128xf32> -> vector<8x128xf32>
    %28 = arith.truncf %27 : vector<8x128xf32> to vector<8x128xbf16>
    %c0_20 = arith.constant 0 : index
    %c0_21 = arith.constant 0 : index
    %29 = vector.load %arg9[%c0_20, %c0_21] : memref<128x128xbf16, #tpu.memory_space<vmem>>, vector<128x128xbf16>
    %cst_22 = arith.constant dense<0.000000e+00> : vector<8x128xf32>
    %30 = tpu.matmul %28, %29, %cst_22 {dimension_numbers = #tpu.dot_dimension_numbers<[1], [0], [0], [1], [0, 0, 1, 1], [], []>} : vector<8x128xbf16>, vector<128x128xbf16>, vector<8x128xf32> -> vector<8x128xf32>
    %c0_23 = arith.constant 0 : index
    %c0_24 = arith.constant 0 : index
    %31 = vector.load %arg10[%c0_23, %c0_24] : memref<1x128xf32, #tpu.memory_space<vmem>>, vector<1x128xf32>
    %32 = vector.broadcast %31 : vector<1x128xf32> to vector<8x128xf32>
    %33 = arith.addf %30, %32 : vector<8x128xf32>
    %cst_25 = arith.constant 0.000000e+00 : f32
    %34 = vector.broadcast %cst_25 : f32 to vector<8x128xf32>
    %35 = arith.cmpf ogt, %33, %34 : vector<8x128xf32>
    %cst_26 = arith.constant 2.000000e-01 : f32
    %36 = vector.broadcast %cst_26 : f32 to vector<8x128xf32>
    %37 = arith.mulf %36, %33 : vector<8x128xf32>
    %38 = arith.select %35, %33, %37 : vector<8x128xi1>, vector<8x128xf32>
    %39 = arith.truncf %38 : vector<8x128xf32> to vector<8x128xbf16>
    %c0_27 = arith.constant 0 : index
    %c0_28 = arith.constant 0 : index
    %40 = vector.load %arg11[%c0_27, %c0_28] : memref<128x128xbf16, #tpu.memory_space<vmem>>, vector<128x128xbf16>
    %cst_29 = arith.constant dense<0.000000e+00> : vector<8x128xf32>
    %41 = tpu.matmul %39, %40, %cst_29 {dimension_numbers = #tpu.dot_dimension_numbers<[1], [0], [0], [1], [0, 0, 1, 1], [], []>} : vector<8x128xbf16>, vector<128x128xbf16>, vector<8x128xf32> -> vector<8x128xf32>
    %42 = arith.truncf %41 : vector<8x128xf32> to vector<8x128xbf16>
    %c0_30 = arith.constant 0 : index
    %c0_31 = arith.constant 0 : index
    %43 = vector.load %arg12[%c0_30, %c0_31] : memref<128x128xbf16, #tpu.memory_space<vmem>>, vector<128x128xbf16>
    %cst_32 = arith.constant dense<0.000000e+00> : vector<8x128xf32>
    %44 = tpu.matmul %42, %43, %cst_32 {dimension_numbers = #tpu.dot_dimension_numbers<[1], [0], [0], [1], [0, 0, 1, 1], [], []>} : vector<8x128xbf16>, vector<128x128xbf16>, vector<8x128xf32> -> vector<8x128xf32>
    %c0_33 = arith.constant 0 : index
    %c0_34 = arith.constant 0 : index
    %45 = vector.load %arg13[%c0_33, %c0_34] : memref<1x128xf32, #tpu.memory_space<vmem>>, vector<1x128xf32>
    %46 = vector.broadcast %45 : vector<1x128xf32> to vector<8x128xf32>
    %47 = arith.addf %44, %46 : vector<8x128xf32>
    %cst_35 = arith.constant 0.000000e+00 : f32
    %48 = vector.broadcast %cst_35 : f32 to vector<8x128xf32>
    %49 = arith.cmpf ogt, %47, %48 : vector<8x128xf32>
    %cst_36 = arith.constant 2.000000e-01 : f32
    %50 = vector.broadcast %cst_36 : f32 to vector<8x128xf32>
    %51 = arith.mulf %50, %47 : vector<8x128xf32>
    %52 = arith.select %49, %47, %51 : vector<8x128xi1>, vector<8x128xf32>
    %53 = arith.truncf %52 : vector<8x128xf32> to vector<8x128xbf16>
    %c0_37 = arith.constant 0 : index
    %c0_38 = arith.constant 0 : index
    %54 = vector.load %arg14[%c0_37, %c0_38] : memref<128x128xbf16, #tpu.memory_space<vmem>>, vector<128x128xbf16>
    %cst_39 = arith.constant dense<0.000000e+00> : vector<8x128xf32>
    %55 = tpu.matmul %53, %54, %cst_39 {dimension_numbers = #tpu.dot_dimension_numbers<[1], [0], [0], [1], [0, 0, 1, 1], [], []>} : vector<8x128xbf16>, vector<128x128xbf16>, vector<8x128xf32> -> vector<8x128xf32>
    %56 = arith.truncf %55 : vector<8x128xf32> to vector<8x128xbf16>
    %c0_40 = arith.constant 0 : index
    %c0_41 = arith.constant 0 : index
    %57 = vector.load %arg15[%c0_40, %c0_41] : memref<128x128xbf16, #tpu.memory_space<vmem>>, vector<128x128xbf16>
    %cst_42 = arith.constant dense<0.000000e+00> : vector<8x128xf32>
    %58 = tpu.matmul %56, %57, %cst_42 {dimension_numbers = #tpu.dot_dimension_numbers<[1], [0], [0], [1], [0, 0, 1, 1], [], []>} : vector<8x128xbf16>, vector<128x128xbf16>, vector<8x128xf32> -> vector<8x128xf32>
    %c0_43 = arith.constant 0 : index
    %c0_44 = arith.constant 0 : index
    %59 = vector.load %arg16[%c0_43, %c0_44] : memref<1x128xf32, #tpu.memory_space<vmem>>, vector<1x128xf32>
    %60 = vector.broadcast %59 : vector<1x128xf32> to vector<8x128xf32>
    %61 = arith.addf %58, %60 : vector<8x128xf32>
    %cst_45 = arith.constant 0.000000e+00 : f32
    %62 = vector.broadcast %cst_45 : f32 to vector<8x128xf32>
    %63 = arith.cmpf ogt, %61, %62 : vector<8x128xf32>
    %cst_46 = arith.constant 2.000000e-01 : f32
    %64 = vector.broadcast %cst_46 : f32 to vector<8x128xf32>
    %65 = arith.mulf %64, %61 : vector<8x128xf32>
    %66 = arith.select %63, %61, %65 : vector<8x128xi1>, vector<8x128xf32>
    %67 = arith.truncf %66 : vector<8x128xf32> to vector<8x128xbf16>
    %c0_47 = arith.constant 0 : index
    %c0_48 = arith.constant 0 : index
    %68 = vector.load %arg17[%c0_47, %c0_48] : memref<128x128xbf16, #tpu.memory_space<vmem>>, vector<128x128xbf16>
    %cst_49 = arith.constant dense<0.000000e+00> : vector<8x128xf32>
    %69 = tpu.matmul %67, %68, %cst_49 {dimension_numbers = #tpu.dot_dimension_numbers<[1], [0], [0], [1], [0, 0, 1, 1], [], []>} : vector<8x128xbf16>, vector<128x128xbf16>, vector<8x128xf32> -> vector<8x128xf32>
    %70 = arith.truncf %69 : vector<8x128xf32> to vector<8x128xbf16>
    %c0_50 = arith.constant 0 : index
    %c0_51 = arith.constant 0 : index
    %71 = vector.load %arg18[%c0_50, %c0_51] : memref<128x128xbf16, #tpu.memory_space<vmem>>, vector<128x128xbf16>
    %cst_52 = arith.constant dense<0.000000e+00> : vector<8x128xf32>
    %72 = tpu.matmul %70, %71, %cst_52 {dimension_numbers = #tpu.dot_dimension_numbers<[1], [0], [0], [1], [0, 0, 1, 1], [], []>} : vector<8x128xbf16>, vector<128x128xbf16>, vector<8x128xf32> -> vector<8x128xf32>
    %c0_53 = arith.constant 0 : index
    %c0_54 = arith.constant 0 : index
    %73 = vector.load %arg19[%c0_53, %c0_54] : memref<1x128xf32, #tpu.memory_space<vmem>>, vector<1x128xf32>
    %74 = vector.broadcast %73 : vector<1x128xf32> to vector<8x128xf32>
    %75 = arith.addf %72, %74 : vector<8x128xf32>
    %cst_55 = arith.constant 0.000000e+00 : f32
    %76 = vector.broadcast %cst_55 : f32 to vector<8x128xf32>
    %77 = arith.cmpf ogt, %75, %76 : vector<8x128xf32>
    %cst_56 = arith.constant 2.000000e-01 : f32
    %78 = vector.broadcast %cst_56 : f32 to vector<8x128xf32>
    %79 = arith.mulf %78, %75 : vector<8x128xf32>
    %80 = arith.select %77, %75, %79 : vector<8x128xi1>, vector<8x128xf32>
    %81 = arith.truncf %80 : vector<8x128xf32> to vector<8x128xbf16>
    %c0_57 = arith.constant 0 : index
    %c0_58 = arith.constant 0 : index
    %82 = vector.load %arg20[%c0_57, %c0_58] : memref<128x128xbf16, #tpu.memory_space<vmem>>, vector<128x128xbf16>
    %cst_59 = arith.constant dense<0.000000e+00> : vector<8x128xf32>
    %83 = tpu.matmul %81, %82, %cst_59 {dimension_numbers = #tpu.dot_dimension_numbers<[1], [0], [0], [1], [0, 0, 1, 1], [], []>} : vector<8x128xbf16>, vector<128x128xbf16>, vector<8x128xf32> -> vector<8x128xf32>
    %84 = arith.truncf %83 : vector<8x128xf32> to vector<8x128xbf16>
    %c0_60 = arith.constant 0 : index
    %c0_61 = arith.constant 0 : index
    %85 = vector.load %arg21[%c0_60, %c0_61] : memref<128x128xbf16, #tpu.memory_space<vmem>>, vector<128x128xbf16>
    %cst_62 = arith.constant dense<0.000000e+00> : vector<8x128xf32>
    %86 = tpu.matmul %84, %85, %cst_62 {dimension_numbers = #tpu.dot_dimension_numbers<[1], [0], [0], [1], [0, 0, 1, 1], [], []>} : vector<8x128xbf16>, vector<128x128xbf16>, vector<8x128xf32> -> vector<8x128xf32>
    %c0_63 = arith.constant 0 : index
    %c0_64 = arith.constant 0 : index
    %87 = vector.load %arg22[%c0_63, %c0_64] : memref<1x128xf32, #tpu.memory_space<vmem>>, vector<1x128xf32>
    %88 = vector.broadcast %87 : vector<1x128xf32> to vector<8x128xf32>
    %89 = arith.addf %86, %88 : vector<8x128xf32>
    %cst_65 = arith.constant 0.000000e+00 : f32
    %90 = vector.broadcast %cst_65 : f32 to vector<8x128xf32>
    %91 = arith.cmpf ogt, %89, %90 : vector<8x128xf32>
    %cst_66 = arith.constant 2.000000e-01 : f32
    %92 = vector.broadcast %cst_66 : f32 to vector<8x128xf32>
    %93 = arith.mulf %92, %89 : vector<8x128xf32>
    %94 = arith.select %91, %89, %93 : vector<8x128xi1>, vector<8x128xf32>
    %c0_67 = arith.constant 0 : index
    %c0_68 = arith.constant 0 : index
    %95 = vector.load %arg31[%c0_67, %c0_68] : memref<8x128xf32, #tpu.memory_space<vmem>>, vector<8x128xf32>
    tpu.vector_store %arg31[%c0_67, %c0_68], %94 {strides = array<i32>} : memref<8x128xf32, #tpu.memory_space<vmem>>, vector<8x128xf32>,
    %96 = arith.truncf %52 : vector<8x128xf32> to vector<8x128xbf16>
    %c0_69 = arith.constant 0 : index
    %c0_70 = arith.constant 0 : index
    %97 = vector.load %arg23[%c0_69, %c0_70] : memref<128x128xbf16, #tpu.memory_space<vmem>>, vector<128x128xbf16>
    %cst_71 = arith.constant dense<0.000000e+00> : vector<8x128xf32>
    %98 = tpu.matmul %96, %97, %cst_71 {dimension_numbers = #tpu.dot_dimension_numbers<[1], [0], [0], [1], [0, 0, 1, 1], [], []>} : vector<8x128xbf16>, vector<128x128xbf16>, vector<8x128xf32> -> vector<8x128xf32>
    %c0_72 = arith.constant 0 : index
    %c0_73 = arith.constant 0 : index
    %99 = vector.load %arg24[%c0_72, %c0_73] : memref<1x128xf32, #tpu.memory_space<vmem>>, vector<1x128xf32>
    %100 = vector.broadcast %99 : vector<1x128xf32> to vector<8x128xf32>
    %101 = arith.addf %98, %100 : vector<8x128xf32>
    %cst_74 = arith.constant 0.000000e+00 : f32
    %102 = vector.broadcast %cst_74 : f32 to vector<8x128xf32>
    %103 = arith.cmpf ogt, %101, %102 : vector<8x128xf32>
    %cst_75 = arith.constant 2.000000e-01 : f32
    %104 = vector.broadcast %cst_75 : f32 to vector<8x128xf32>
    %105 = arith.mulf %104, %101 : vector<8x128xf32>
    %106 = arith.select %103, %101, %105 : vector<8x128xi1>, vector<8x128xf32>
    %107 = arith.truncf %106 : vector<8x128xf32> to vector<8x128xbf16>
    %c0_76 = arith.constant 0 : index
    %c0_77 = arith.constant 0 : index
    %108 = vector.load %arg25[%c0_76, %c0_77] : memref<128x128xbf16, #tpu.memory_space<vmem>>, vector<128x128xbf16>
    %cst_78 = arith.constant dense<0.000000e+00> : vector<8x128xf32>
    %109 = tpu.matmul %107, %108, %cst_78 {dimension_numbers = #tpu.dot_dimension_numbers<[1], [0], [0], [1], [0, 0, 1, 1], [], []>} : vector<8x128xbf16>, vector<128x128xbf16>, vector<8x128xf32> -> vector<8x128xf32>
    %c0_79 = arith.constant 0 : index
    %c0_80 = arith.constant 0 : index
    %110 = vector.load %arg26[%c0_79, %c0_80] : memref<1x128xf32, #tpu.memory_space<vmem>>, vector<1x128xf32>
    %111 = vector.broadcast %110 : vector<1x128xf32> to vector<8x128xf32>
    %112 = arith.addf %109, %111 : vector<8x128xf32>
    %cst_81 = arith.constant dense<0xFF800000> : vector<8xf32>
    %113 = vector.multi_reduction <maximumf>, %112, %cst_81 [1] : vector<8x128xf32> to vector<8xf32>
    %114 = vector.shape_cast %113 : vector<8xf32> to vector<8x1xf32>
    %115 = vector.broadcast %114 : vector<8x1xf32> to vector<8x128xf32>
    %116 = arith.subf %112, %115 : vector<8x128xf32>
    %117 = math.exp %116 : vector<8x128xf32>
    %cst_82 = arith.constant dense<0.000000e+00> : vector<8xf32>
    %118 = vector.multi_reduction <add>, %117, %cst_82 [1] : vector<8x128xf32> to vector<8xf32>
    %119 = vector.shape_cast %118 : vector<8xf32> to vector<8x1xf32>
    %120 = tpu.reciprocal %119 {approx = true} : vector<8x1xf32> -> vector<8x1xf32>
    %121 = vector.broadcast %120 : vector<8x1xf32> to vector<8x128xf32>
    %122 = arith.mulf %117, %121 : vector<8x128xf32>
    %c0_83 = arith.constant 0 : index
    %c0_84 = arith.constant 0 : index
    %123 = vector.load %arg32[%c0_83, %c0_84] : memref<8x128xf32, #tpu.memory_space<vmem>>, vector<8x128xf32>
    tpu.vector_store %arg32[%c0_83, %c0_84], %122 {strides = array<i32>} : memref<8x128xf32, #tpu.memory_space<vmem>>, vector<8x128xf32>,
    %c0_85 = arith.constant 0 : index
    %124 = memref.load %arg1[%c0_85] : memref<1xf32, #tpu.memory_space<smem>>
    %125 = arith.truncf %52 : vector<8x128xf32> to vector<8x128xbf16>
    %c0_86 = arith.constant 0 : index
    %c0_87 = arith.constant 0 : index
    %126 = vector.load %arg27[%c0_86, %c0_87] : memref<128x128xbf16, #tpu.memory_space<vmem>>, vector<128x128xbf16>
    %cst_88 = arith.constant dense<0.000000e+00> : vector<8x128xf32>
    %127 = tpu.matmul %125, %126, %cst_88 {dimension_numbers = #tpu.dot_dimension_numbers<[1], [0], [0], [1], [0, 0, 1, 1], [], []>} : vector<8x128xbf16>, vector<128x128xbf16>, vector<8x128xf32> -> vector<8x128xf32>
    %128 = vector.broadcast %124 : f32 to vector<8x128xf32>
    %129 = arith.mulf %127, %128 : vector<8x128xf32>
    %c0_89 = arith.constant 0 : index
    %c0_90 = arith.constant 0 : index
    %130 = vector.load %arg28[%c0_89, %c0_90] : memref<1x128xf32, #tpu.memory_space<vmem>>, vector<1x128xf32>
    %131 = vector.broadcast %130 : vector<1x128xf32> to vector<8x128xf32>
    %132 = arith.addf %129, %131 : vector<8x128xf32>
    %cst_91 = arith.constant 0.000000e+00 : f32
    %133 = vector.broadcast %cst_91 : f32 to vector<8x128xf32>
    %134 = arith.cmpf ogt, %132, %133 : vector<8x128xf32>
    %cst_92 = arith.constant 2.000000e-01 : f32
    %135 = vector.broadcast %cst_92 : f32 to vector<8x128xf32>
    %136 = arith.mulf %135, %132 : vector<8x128xf32>
    %137 = arith.select %134, %132, %136 : vector<8x128xi1>, vector<8x128xf32>
    %138 = arith.truncf %137 : vector<8x128xf32> to vector<8x128xbf16>
    %c0_93 = arith.constant 0 : index
    %c0_94 = arith.constant 0 : index
    %139 = vector.load %arg29[%c0_93, %c0_94] : memref<128x128xbf16, #tpu.memory_space<vmem>>, vector<128x128xbf16>
    %cst_95 = arith.constant dense<0.000000e+00> : vector<8x128xf32>
    %140 = tpu.matmul %138, %139, %cst_95 {dimension_numbers = #tpu.dot_dimension_numbers<[1], [0], [0], [1], [0, 0, 1, 1], [], []>} : vector<8x128xbf16>, vector<128x128xbf16>, vector<8x128xf32> -> vector<8x128xf32>
    %c0_96 = arith.constant 0 : index
    %c0_97 = arith.constant 0 : index
    %141 = vector.load %arg30[%c0_96, %c0_97] : memref<1x128xf32, #tpu.memory_space<vmem>>, vector<1x128xf32>
    %142 = vector.broadcast %141 : vector<1x128xf32> to vector<8x128xf32>
    %143 = arith.addf %140, %142 : vector<8x128xf32>
    %cst_98 = arith.constant 0.000000e+00 : f32
    %144 = vector.broadcast %cst_98 : f32 to vector<8x128xf32>
    %145 = arith.subf %144, %143 : vector<8x128xf32>
    %146 = math.exp %145 : vector<8x128xf32>
    %cst_99 = arith.constant 1.000000e+00 : f32
    %147 = vector.broadcast %cst_99 : f32 to vector<8x128xf32>
    %148 = arith.addf %147, %146 : vector<8x128xf32>
    %cst_100 = arith.constant 1.000000e+00 : f32
    %149 = vector.broadcast %cst_100 : f32 to vector<8x128xf32>
    %150 = arith.divf %149, %148 : vector<8x128xf32>
    %c0_101 = arith.constant 0 : index
    %c0_102 = arith.constant 0 : index
    %151 = vector.load %arg33[%c0_101, %c0_102] : memref<8x128xf32, #tpu.memory_space<vmem>>, vector<8x128xf32>
    tpu.vector_store %arg33[%c0_101, %c0_102], %150 {strides = array<i32>} : memref<8x128xf32, #tpu.memory_space<vmem>>, vector<8x128xf32>,
    return
  }
  func.func @transform_0(%arg0: i32) -> i32 {
    %c0_i32 = arith.constant 0 : i32
    %c0_i32_0 = arith.constant 0 : i32
    return %c0_i32 : i32
  }
  func.func @transform_1(%arg0: i32) -> (i32, i32) {
    %c0_i32 = arith.constant 0 : i32
    %c0_i32_0 = arith.constant 0 : i32
    return %arg0, %c0_i32 : i32, i32
  }
  func.func @transform_2(%arg0: i32) -> (i32, i32) {
    %c0_i32 = arith.constant 0 : i32
    %c0_i32_0 = arith.constant 0 : i32
    %c0_i32_1 = arith.constant 0 : i32
    return %c0_i32, %c0_i32_0 : i32, i32
  }
  func.func @transform_3(%arg0: i32) -> (i32, i32) {
    %c0_i32 = arith.constant 0 : i32
    %c0_i32_0 = arith.constant 0 : i32
    %c0_i32_1 = arith.constant 0 : i32
    return %c0_i32, %c0_i32_0 : i32, i32
  }
  func.func @transform_4(%arg0: i32) -> (i32, i32) {
    %c0_i32 = arith.constant 0 : i32
    %c0_i32_0 = arith.constant 0 : i32
    %c0_i32_1 = arith.constant 0 : i32
    return %c0_i32, %c0_i32_0 : i32, i32
  }
  func.func @transform_5(%arg0: i32) -> (i32, i32) {
    %c0_i32 = arith.constant 0 : i32
    %c0_i32_0 = arith.constant 0 : i32
    %c0_i32_1 = arith.constant 0 : i32
    return %c0_i32, %c0_i32_0 : i32, i32
  }
  func.func @transform_6(%arg0: i32) -> (i32, i32) {
    %c0_i32 = arith.constant 0 : i32
    %c0_i32_0 = arith.constant 0 : i32
    %c0_i32_1 = arith.constant 0 : i32
    return %c0_i32, %c0_i32_0 : i32, i32
  }
  func.func @transform_7(%arg0: i32) -> (i32, i32) {
    %c0_i32 = arith.constant 0 : i32
    %c0_i32_0 = arith.constant 0 : i32
    %c0_i32_1 = arith.constant 0 : i32
    return %c0_i32, %c0_i32_0 : i32, i32
  }
  func.func @transform_8(%arg0: i32) -> (i32, i32) {
    %c0_i32 = arith.constant 0 : i32
    %c0_i32_0 = arith.constant 0 : i32
    %c0_i32_1 = arith.constant 0 : i32
    return %c0_i32, %c0_i32_0 : i32, i32
  }
  func.func @transform_9(%arg0: i32) -> (i32, i32) {
    %c0_i32 = arith.constant 0 : i32
    %c0_i32_0 = arith.constant 0 : i32
    %c0_i32_1 = arith.constant 0 : i32
    return %c0_i32, %c0_i32_0 : i32, i32
  }
  func.func @transform_10(%arg0: i32) -> (i32, i32) {
    %c0_i32 = arith.constant 0 : i32
    %c0_i32_0 = arith.constant 0 : i32
    %c0_i32_1 = arith.constant 0 : i32
    return %c0_i32, %c0_i32_0 : i32, i32
  }
  func.func @transform_11(%arg0: i32) -> (i32, i32) {
    %c0_i32 = arith.constant 0 : i32
    %c0_i32_0 = arith.constant 0 : i32
    %c0_i32_1 = arith.constant 0 : i32
    return %c0_i32, %c0_i32_0 : i32, i32
  }
  func.func @transform_12(%arg0: i32) -> (i32, i32) {
    %c0_i32 = arith.constant 0 : i32
    %c0_i32_0 = arith.constant 0 : i32
    %c0_i32_1 = arith.constant 0 : i32
    return %c0_i32, %c0_i32_0 : i32, i32
  }
  func.func @transform_13(%arg0: i32) -> (i32, i32) {
    %c0_i32 = arith.constant 0 : i32
    %c0_i32_0 = arith.constant 0 : i32
    %c0_i32_1 = arith.constant 0 : i32
    return %c0_i32, %c0_i32_0 : i32, i32
  }
  func.func @transform_14(%arg0: i32) -> (i32, i32) {
    %c0_i32 = arith.constant 0 : i32
    %c0_i32_0 = arith.constant 0 : i32
    %c0_i32_1 = arith.constant 0 : i32
    return %c0_i32, %c0_i32_0 : i32, i32
  }
  func.func @transform_15(%arg0: i32) -> (i32, i32) {
    %c0_i32 = arith.constant 0 : i32
    %c0_i32_0 = arith.constant 0 : i32
    %c0_i32_1 = arith.constant 0 : i32
    return %c0_i32, %c0_i32_0 : i32, i32
  }
  func.func @transform_16(%arg0: i32) -> (i32, i32) {
    %c0_i32 = arith.constant 0 : i32
    %c0_i32_0 = arith.constant 0 : i32
    %c0_i32_1 = arith.constant 0 : i32
    return %c0_i32, %c0_i32_0 : i32, i32
  }
  func.func @transform_17(%arg0: i32) -> (i32, i32) {
    %c0_i32 = arith.constant 0 : i32
    %c0_i32_0 = arith.constant 0 : i32
    %c0_i32_1 = arith.constant 0 : i32
    return %c0_i32, %c0_i32_0 : i32, i32
  }
  func.func @transform_18(%arg0: i32) -> (i32, i32) {
    %c0_i32 = arith.constant 0 : i32
    %c0_i32_0 = arith.constant 0 : i32
    %c0_i32_1 = arith.constant 0 : i32
    return %c0_i32, %c0_i32_0 : i32, i32
  }
  func.func @transform_19(%arg0: i32) -> (i32, i32) {
    %c0_i32 = arith.constant 0 : i32
    %c0_i32_0 = arith.constant 0 : i32
    %c0_i32_1 = arith.constant 0 : i32
    return %c0_i32, %c0_i32_0 : i32, i32
  }
  func.func @transform_20(%arg0: i32) -> (i32, i32) {
    %c0_i32 = arith.constant 0 : i32
    %c0_i32_0 = arith.constant 0 : i32
    %c0_i32_1 = arith.constant 0 : i32
    return %c0_i32, %c0_i32_0 : i32, i32
  }
  func.func @transform_21(%arg0: i32) -> (i32, i32) {
    %c0_i32 = arith.constant 0 : i32
    %c0_i32_0 = arith.constant 0 : i32
    %c0_i32_1 = arith.constant 0 : i32
    return %c0_i32, %c0_i32_0 : i32, i32
  }
  func.func @transform_22(%arg0: i32) -> (i32, i32) {
    %c0_i32 = arith.constant 0 : i32
    %c0_i32_0 = arith.constant 0 : i32
    %c0_i32_1 = arith.constant 0 : i32
    return %c0_i32, %c0_i32_0 : i32, i32
  }
  func.func @transform_23(%arg0: i32) -> (i32, i32) {
    %c0_i32 = arith.constant 0 : i32
    %c0_i32_0 = arith.constant 0 : i32
    %c0_i32_1 = arith.constant 0 : i32
    return %c0_i32, %c0_i32_0 : i32, i32
  }
  func.func @transform_24(%arg0: i32) -> (i32, i32) {
    %c0_i32 = arith.constant 0 : i32
    %c0_i32_0 = arith.constant 0 : i32
    %c0_i32_1 = arith.constant 0 : i32
    return %c0_i32, %c0_i32_0 : i32, i32
  }
  func.func @transform_25(%arg0: i32) -> (i32, i32) {
    %c0_i32 = arith.constant 0 : i32
    %c0_i32_0 = arith.constant 0 : i32
    %c0_i32_1 = arith.constant 0 : i32
    return %c0_i32, %c0_i32_0 : i32, i32
  }
  func.func @transform_26(%arg0: i32) -> (i32, i32) {
    %c0_i32 = arith.constant 0 : i32
    %c0_i32_0 = arith.constant 0 : i32
    %c0_i32_1 = arith.constant 0 : i32
    return %c0_i32, %c0_i32_0 : i32, i32
  }
  func.func @transform_27(%arg0: i32) -> (i32, i32) {
    %c0_i32 = arith.constant 0 : i32
    %c0_i32_0 = arith.constant 0 : i32
    %c0_i32_1 = arith.constant 0 : i32
    return %c0_i32, %c0_i32_0 : i32, i32
  }
  func.func @transform_28(%arg0: i32) -> (i32, i32) {
    %c0_i32 = arith.constant 0 : i32
    %c0_i32_0 = arith.constant 0 : i32
    %c0_i32_1 = arith.constant 0 : i32
    return %c0_i32, %c0_i32_0 : i32, i32
  }
  func.func @transform_29(%arg0: i32) -> (i32, i32) {
    %c0_i32 = arith.constant 0 : i32
    %c0_i32_0 = arith.constant 0 : i32
    %c0_i32_1 = arith.constant 0 : i32
    return %c0_i32, %c0_i32_0 : i32, i32
  }
  func.func @transform_30(%arg0: i32) -> (i32, i32) {
    %c0_i32 = arith.constant 0 : i32
    %c0_i32_0 = arith.constant 0 : i32
    return %arg0, %c0_i32 : i32, i32
  }
  func.func @transform_31(%arg0: i32) -> (i32, i32) {
    %c0_i32 = arith.constant 0 : i32
    %c0_i32_0 = arith.constant 0 : i32
    return %arg0, %c0_i32 : i32, i32
  }
  func.func @transform_32(%arg0: i32) -> (i32, i32) {
    %c0_i32 = arith.constant 0 : i32
    %c0_i32_0 = arith.constant 0 : i32
    return %arg0, %c0_i32 : i32, i32
  }
}

</mosaic_0001>

<bundles_post_ra>
// kernel: tpu_custom_call.1
= control target key start
LH: loop header
LB: loop body
LE: loop exit
PB: predicated region body
PF: predicated region fallthrough
CT: control target
= control target key end

     0   :  { %s3213_s6 = smov 1   ;;  %s3214_s10 = smov 2   ;;  %s3632_s0 = inlined_call_operand.smem [shape: u32[33], index: -1, kind: input, shape index: {}] }
   0x1   :  { %s3276_s5 = sld [smem:[%s3632_s0]]   ;;  %s3215_s14 = smov 3  }
   0x2   :  { %s3281_s9 = sld [smem:[%s3632_s0 + %s3213_s6]]   ;;  %s3216_s18 = smov 4  }
   0x3   :  { %s3286_s13 = sld [smem:[%s3632_s0 + %s3214_s10]]   ;;  %s3217_s22 = smov 5  }
   0x4   :  { %s3291_s17 = sld [smem:[%s3632_s0 + %s3215_s14]]   ;;  %s3218_s26 = smov 6  }
   0x5   :  { %s3296_s21 = sld [smem:[%s3632_s0 + %s3216_s18]]   ;;  %s3219_s30 = smov 7  }
   0x6   :  { %s3301_s25 = sld [smem:[%s3632_s0 + %s3217_s22]]   ;;  %s3220_s4 = smov 8  }
   0x7   :  { %3637 = sst [smem:[#allocation48_spill]] %s3276_s5  ;;  %s3221_s10 = smov 9  }
   0x8   :  { %s3306_s29 = sld [smem:[%s3632_s0 + %s3218_s26]]   ;;  %s3222_s15 = smov 10  }
   0x9   :  { %s3311_s3 = sld [smem:[%s3632_s0 + %s3219_s30]]   ;;  %s3223_s20 = smov 11  }
   0xa   :  { %3638 = sst [smem:[#allocation49_spill]] %s3291_s17  ;;  %s3224_s26 = smov 12  }
   0xb   :  { %s3316_s8 = sld [smem:[%s3632_s0 + %s3220_s4]]   ;;  %s3225_s1 = smov 13  }
   0xc   :  { %s3321_s14 = sld [smem:[%s3632_s0 + %s3221_s10]]   ;;  %s3226_s7 = smov 14  }
   0xd   :  { %s3326_s19 = sld [smem:[%s3632_s0 + %s3222_s15]]   ;;  %s3227_s15 = smov 15  }
   0xe   :  { %3639 = sst [smem:[#allocation50_spill]] %s3306_s29  ;;  %s3228_s22 = smov 16  }
   0xf   :  { %s3331_s24 = sld [smem:[%s3632_s0 + %s3223_s20]]   ;;  %s3229_s28 = smov 17  }
  0x10   :  { %s3336_s30 = sld [smem:[%s3632_s0 + %s3224_s26]]  }
  0x11   :  { %s3341_s6 = sld [smem:[%s3632_s0 + %s3225_s1]]  }
  0x12   :  { %3640 = sst [smem:[#allocation51_spill]] %s3321_s14 }
  0x13   :  { %s3346_s12 = sld [smem:[%s3632_s0 + %s3226_s7]]   ;;  %s3230_s7 = smov 18  }
  0x14   :  { %s3351_s20 = sld [smem:[%s3632_s0 + %s3227_s15]]   ;;  %s3231_s15 = smov 19  }
  0x15   :  { %s3356_s27 = sld [smem:[%s3632_s0 + %s3228_s22]]   ;;  %s3232_s22 = smov 20  }
  0x16   :  { %3641 = sst [smem:[#allocation52_spill]] %s3336_s30 }
  0x17   :  { %s3361_s4 = sld [smem:[%s3632_s0 + %s3229_s28]]   ;;  %s3233_s28 = smov 21  }
  0x18   :  { %s3366_s5 = sld [smem:[%s3632_s0 + %s3230_s7]]   ;;  %s3234_s7 = smov 22  }
  0x19   :  { %s3376_s30 = sld [smem:[%s3632_s0 + %s3232_s22]]   ;;  %s3236_s22 = smov 24  }
  0x1a   :  { %3642 = sst [smem:[#allocation53_spill]] %s3351_s20 }
  0x1b   :  { %s3371_s20 = sld [smem:[%s3632_s0 + %s3231_s15]]   ;;  %s3235_s15 = smov 23  }
  0x1c   :  { %s3381_s14 = sld [smem:[%s3632_s0 + %s3233_s28]]   ;;  %s3237_s28 = smov 25  }
  0x1d   :  { %s3391_s29 = sld [smem:[%s3632_s0 + %s3235_s15]]   ;;  %s3239_s15 = smov 27  }
  0x1e   :  { %3643 = sst [smem:[#allocation54_spill]] %s3366_s5 }
  0x1f   :  { %s3386_s5 = sld [smem:[%s3632_s0 + %s3234_s7]]   ;;  %s3238_s7 = smov 26  }
  0x20   :  { %s3396_s17 = sld [smem:[%s3632_s0 + %s3236_s22]]   ;;  %s3240_s22 = smov 28  }
  0x21   :  { %3644 = sst [smem:[#allocation55_spill]] %s3371_s20 }
  0x22   :  { %3645 = sst [smem:[#allocation56_spill]] %s3381_s14 }
  0x23   :  { %3647 = sst [smem:[#allocation58_spill]] %s3391_s29 }
  0x24   :  { %s3401_s14 = sld [smem:[%s3632_s0 + %s3237_s28]]   ;;  %s3241_s28 = smov 29  }
  0x25   :  { %3646 = sst [smem:[#allocation57_spill]] %s3386_s5 }
  0x26   :  { %s3406_s5 = sld [smem:[%s3632_s0 + %s3238_s7]]   ;;  %s3242_s7 = smov 30  }
  0x27   :  { %s3411_s29 = sld [smem:[%s3632_s0 + %s3239_s15]]   ;;  %s3243_s15 = smov 31  }
  0x28   :  { %s3416_s20 = sld [smem:[%s3632_s0 + %s3240_s22]]   ;;  %s3244_s22 = smov 32  }
  0x2a   :  { %3648 = sst [smem:[#allocation59_spill]] %s3401_s14 }
  0x2b   :  { %s3421_s14 = sld [smem:[%s3632_s0 + %s3241_s28]]  }
  0x2c   :  { %3649 = sst [smem:[#allocation60_spill]] %s3406_s5 }
  0x2d   :  { %3650 = sst [smem:[#allocation61_spill]] %s3411_s29 }
  0x2e   :  { %3651 = sst [smem:[#allocation62_spill]] %s3416_s20 }
  0x2f   :  { %s3426_s5 = sld [smem:[%s3632_s0 + %s3242_s7]]  }
  0x30   :  { %s3431_s29 = sld [smem:[%s3632_s0 + %s3243_s15]]  }
  0x31   :  { %s3436_s20 = sld [smem:[%s3632_s0 + %s3244_s22]]  }
  0x32   :  { %72 = vsyncpa [#allocation4], 0 }
  0x33   :  { %73 = vsyncpa [#allocation7], 0 }
  0x34   :  { %74 = vsyncpa [#allocation10], 0 }
  0x35   :  { %75 = vsyncpa [#allocation13], 0 }
  0x36   :  { %76 = vsyncpa [#allocation16], 0 }
  0x37   :  { %77 = vsyncpa [#allocation19], 0 }
  0x38   :  { %78 = vsyncpa [#allocation22], 0 }
  0x39   :  { %79 = vsyncpa [#allocation25], 0 }
  0x3a   :  { %80 = vsyncpa [#allocation28], 0 }
  0x3b   :  { %81 = vsyncpa [#allocation31], 0 }
  0x3c   :  { %82 = vsyncpa [#allocation5], 0  ;;  %s101_s28 = sshll.u32 %s3286_s13, 4  ;;  %s102_s28 = int_to_ptr.hbm [resolvable:$true] %s101_s28 }
  0x3d   :  { %83 = vsyncpa [#allocation34], 0  ;;  %s3245_s0 = smov [#allocation6]   ;;  %s129_s2 = sshll.u32 %s3301_s25, 4  ;;  %s130_s2 = int_to_ptr.hbm [resolvable:$true] %s129_s2 }
  0x3e   :  { %s103_s1 = sshll.u32 %s3245_s0, 4  ;;  %s2685_s7 = sshra.s32 %s102_s28, 4  ;;  %s104_s1 = int_to_ptr.vmem [resolvable:$true] %s103_s1  ;;  %s2686_s7 = int_to_ptr.hbm [resolvable:$true] %s2685_s7 }
  0x3f   :  { %s2687_s10 = scalar_lea.hbm %s2686_s7, 64  ;;  %s2689_s11 = scalar_lea.hbm %s3286_s13, 64 }
  0x40   :  { %p2688_p0 = scmp.ne.s32.totalorder %s2686_s7, %s2687_s10  ;;  %p2690_p1 = scmp.lt.s32.totalorder %s2686_s7, %s3286_s13 }
  0x41   :  { %p2691_p2 = scmp.lt.s32.totalorder %s2689_s11, %s2687_s10 }
  0x43   :  { %p2692_p3 = por %p2691_p2, %p2690_p1 }
  0x45   :  { %p2693_p4 = pnand %p2692_p3, %p2688_p0 }
  0x47   :  { %2696 = shalt.err (!%p2693_p4)
}
  0x48   :  { %s3246_s15 = smov 64   ;;  %s3247_s16 = smov 4  }
  0x49   :  { %109 = dma.hbm_to_vmem [thread:$0]  %s102_s28, 1024, %s104_s1, [#allocation7], %s3246_s15, %s3246_s15, %s3247_s16  }
  0x4a   :  { %s3248_s18 = smov [#allocation9]   ;;  %s157_s23 = sshll.u32 %s3316_s8, 4  ;;  %s3446_s23 = int_to_ptr.hbm [resolvable:$true] %s157_s23 }
  0x4b   :  { %s131_s22 = sshll.u32 %s3248_s18, 4  ;;  %s2709_s13 = sshra.s32 %s130_s2, 4  ;;  %s132_s22 = int_to_ptr.vmem [resolvable:$true] %s131_s22  ;;  %s2710_s13 = int_to_ptr.hbm [resolvable:$true] %s2709_s13 }
  0x4c   :  { %s2711_s26 = scalar_lea.hbm %s2710_s13, 64  ;;  %s2713_s0 = scalar_lea.hbm %s3301_s25, 64 }
  0x4d   :  { %p2712_p5 = scmp.ne.s32.totalorder %s2710_s13, %s2711_s26  ;;  %p2714_p6 = scmp.lt.s32.totalorder %s2710_s13, %s3301_s25 }
  0x4e   :  { %p2715_p7 = scmp.lt.s32.totalorder %s2713_s0, %s2711_s26 }
  0x50   :  { %p2716_p8 = por %p2715_p7, %p2714_p6 }
  0x52   :  { %p2717_p9 = pnand %p2716_p8, %p2712_p5 }
  0x54   :  { %2720 = shalt.err (!%p2717_p9)
}
  0x55   :  { %137 = dma.hbm_to_vmem [thread:$0]  %s130_s2, 1024, %s132_s22, [#allocation10], %s3246_s15, %s3246_s15, %s3247_s16  }
  0x56   :  { %s185_s28 = sshll.u32 %s3331_s24, 4  ;;  %s3249_s1 = smov [#allocation12]   ;;  %s3454_s28 = int_to_ptr.hbm [resolvable:$true] %s185_s28 }
  0x57   :  { %s159_s7 = sshll.u32 %s3249_s1, 4  ;;  %s2733_s10 = sshra.s32 %s3446_s23, 4  ;;  %s160_s7 = int_to_ptr.vmem [resolvable:$true] %s159_s7  ;;  %s2734_s10 = int_to_ptr.hbm [resolvable:$true] %s2733_s10 }
  0x58   :  { %s2735_s25 = scalar_lea.hbm %s2734_s10, 64  ;;  %s2737_s11 = scalar_lea.hbm %s3316_s8, 64 }
  0x59   :  { %p2736_p10 = scmp.ne.s32.totalorder %s2734_s10, %s2735_s25  ;;  %p2738_p11 = scmp.lt.s32.totalorder %s2734_s10, %s3316_s8 }
  0x5a   :  { %p2739_p12 = scmp.lt.s32.totalorder %s2737_s11, %s2735_s25 }
  0x5c   :  { %p2740_p13 = por %p2739_p12, %p2738_p11 }
  0x5e   :  { %p2741_p0 = pnand %p2740_p13, %p2736_p10 }
  0x60   :  { %2744 = shalt.err (!%p2741_p0)
}
  0x61   :  { %165 = dma.hbm_to_vmem [thread:$0]  %s3446_s23, 1024, %s160_s7, [#allocation13], %s3246_s15, %s3246_s15, %s3247_s16  }
  0x62   :  { %s3250_s2 = smov [#allocation15]   ;;  %s213_s22 = sshll.u32 %s3346_s12, 4  ;;  %s3464_s22 = int_to_ptr.hbm [resolvable:$true] %s213_s22 }
  0x63   :  { %s187_s18 = sshll.u32 %s3250_s2, 4  ;;  %s2757_s8 = sshra.s32 %s3454_s28, 4  ;;  %s188_s18 = int_to_ptr.vmem [resolvable:$true] %s187_s18  ;;  %s2758_s8 = int_to_ptr.hbm [resolvable:$true] %s2757_s8 }
  0x64   :  { %s2759_s13 = scalar_lea.hbm %s2758_s8, 64  ;;  %s2761_s26 = scalar_lea.hbm %s3331_s24, 64 }
  0x65   :  { %p2760_p1 = scmp.ne.s32.totalorder %s2758_s8, %s2759_s13  ;;  %p2762_p2 = scmp.lt.s32.totalorder %s2758_s8, %s3331_s24 }
  0x66   :  { %p2763_p3 = scmp.lt.s32.totalorder %s2761_s26, %s2759_s13 }
  0x68   :  { %p2764_p4 = por %p2763_p3, %p2762_p2 }
  0x6a   :  { %p2765_p5 = pnand %p2764_p4, %p2760_p1 }
  0x6c   :  { %2768 = shalt.err (!%p2765_p5)
}
  0x6d   :  { %193 = dma.hbm_to_vmem [thread:$0]  %s3454_s28, 1024, %s188_s18, [#allocation16], %s3246_s15, %s3246_s15, %s3247_s16  }
  0x6e   :  { %s241_s23 = sshll.u32 %s3361_s4, 4  ;;  %s3251_s0 = smov [#allocation18]   ;;  %s3474_s23 = int_to_ptr.hbm [resolvable:$true] %s241_s23 }
  0x6f   :  { %s215_s1 = sshll.u32 %s3251_s0, 4  ;;  %s2781_s24 = sshra.s32 %s3464_s22, 4  ;;  %s216_s1 = int_to_ptr.vmem [resolvable:$true] %s215_s1  ;;  %s2782_s24 = int_to_ptr.hbm [resolvable:$true] %s2781_s24 }
  0x70   :  { %s2783_s7 = scalar_lea.hbm %s2782_s24, 64  ;;  %s2785_s10 = scalar_lea.hbm %s3346_s12, 64 }
  0x71   :  { %p2784_p6 = scmp.ne.s32.totalorder %s2782_s24, %s2783_s7  ;;  %p2786_p7 = scmp.lt.s32.totalorder %s2782_s24, %s3346_s12 }
  0x72   :  { %p2787_p8 = scmp.lt.s32.totalorder %s2785_s10, %s2783_s7 }
  0x74   :  { %p2788_p9 = por %p2787_p8, %p2786_p7 }
  0x76   :  { %p2789_p10 = pnand %p2788_p9, %p2784_p6 }
  0x78   :  { %2792 = shalt.err (!%p2789_p10)
}
  0x79   :  { %221 = dma.hbm_to_vmem [thread:$0]  %s3464_s22, 1024, %s216_s1, [#allocation19], %s3246_s15, %s3246_s15, %s3247_s16  }
  0x7a   :  { %s3252_s28 = smov [#allocation21]   ;;  %s269_s11 = sshll.u32 %s3376_s30, 4  ;;  %s3484_s11 = int_to_ptr.hbm [resolvable:$true] %s269_s11 }
  0x7b   :  { %s243_s25 = sshll.u32 %s3252_s28, 4  ;;  %s2805_s12 = sshra.s32 %s3474_s23, 4  ;;  %s244_s25 = int_to_ptr.vmem [resolvable:$true] %s243_s25  ;;  %s2806_s12 = int_to_ptr.hbm [resolvable:$true] %s2805_s12 }
  0x7c   :  { %s2807_s2 = scalar_lea.hbm %s2806_s12, 64  ;;  %s2809_s18 = scalar_lea.hbm %s3361_s4, 64 }
  0x7d   :  { %p2808_p11 = scmp.ne.s32.totalorder %s2806_s12, %s2807_s2  ;;  %p2810_p12 = scmp.lt.s32.totalorder %s2806_s12, %s3361_s4 }
  0x7e   :  { %p2811_p13 = scmp.lt.s32.totalorder %s2809_s18, %s2807_s2 }
  0x80   :  { %p2812_p0 = por %p2811_p13, %p2810_p12 }
  0x82   :  { %p2813_p1 = pnand %p2812_p0, %p2808_p11 }
  0x84   :  { %2816 = shalt.err (!%p2813_p1)
}
  0x85   :  { %249 = dma.hbm_to_vmem [thread:$0]  %s3474_s23, 1024, %s244_s25, [#allocation22], %s3246_s15, %s3246_s15, %s3247_s16  }
  0x86   :  { %s299_s22 = sshll.u32 %s3396_s17, 4  ;;  %s3253_s8 = smov [#allocation24]   ;;  %s3494_s22 = int_to_ptr.hbm [resolvable:$true] %s299_s22 }
  0x87   :  { %s271_s13 = sshll.u32 %s3253_s8, 4  ;;  %s2829_s4 = sshra.s32 %s3484_s11, 4  ;;  %s272_s13 = int_to_ptr.vmem [resolvable:$true] %s271_s13  ;;  %s2830_s4 = int_to_ptr.hbm [resolvable:$true] %s2829_s4 }
  0x88   :  { %s2831_s26 = scalar_lea.hbm %s2830_s4, 64  ;;  %s2833_s0 = scalar_lea.hbm %s3376_s30, 64 }
  0x89   :  { %p2832_p2 = scmp.ne.s32.totalorder %s2830_s4, %s2831_s26  ;;  %p2834_p3 = scmp.lt.s32.totalorder %s2830_s4, %s3376_s30 }
  0x8a   :  { %p2835_p4 = scmp.lt.s32.totalorder %s2833_s0, %s2831_s26 }
  0x8c   :  { %p2836_p5 = por %p2835_p4, %p2834_p3 }
  0x8e   :  { %p2837_p6 = pnand %p2836_p5, %p2832_p2 }
  0x90   :  { %2840 = shalt.err (!%p2837_p6)
}
  0x91   :  { %277 = dma.hbm_to_vmem [thread:$0]  %s3484_s11, 1024, %s272_s13, [#allocation25], %s3246_s15, %s3246_s15, %s3247_s16  }
  0x92   :  { %s3254_s23 = smov [#allocation27]   ;;  %s91_s24 = sshll.u32 %s3281_s9, 4  ;;  %s92_s24 = int_to_ptr.hbm [resolvable:$true] %s91_s24 }
  0x93   :  { %s301_s1 = sshll.u32 %s3254_s23, 4  ;;  %s2853_s7 = sshra.s32 %s3494_s22, 4  ;;  %s302_s1 = int_to_ptr.vmem [resolvable:$true] %s301_s1  ;;  %s2854_s7 = int_to_ptr.hbm [resolvable:$true] %s2853_s7 }
  0x94   :  { %s2855_s30 = scalar_lea.hbm %s2854_s7, 64  ;;  %s2857_s10 = scalar_lea.hbm %s3396_s17, 64 }
  0x95   :  { %p2856_p7 = scmp.ne.s32.totalorder %s2854_s7, %s2855_s30  ;;  %p2858_p8 = scmp.lt.s32.totalorder %s2854_s7, %s3396_s17 }
  0x96   :  { %p2859_p9 = scmp.lt.s32.totalorder %s2857_s10, %s2855_s30 }
  0x98   :  { %p2860_p10 = por %p2859_p9, %p2858_p8 }
  0x9a   :  { %p2861_p11 = pnand %p2860_p10, %p2856_p7 }
  0x9c   :  { %2864 = shalt.err (!%p2861_p11)
}
  0x9d   :  { %307 = dma.hbm_to_vmem [thread:$0]  %s3494_s22, 1024, %s302_s1, [#allocation28], %s3246_s15, %s3246_s15, %s3247_s16  }
  0x9e   :  { %s116_s28 = sshll.u32 %s3296_s21, 4  ;;  %s3255_s25 = smov [#allocation3]   ;;  %s3512_s28 = int_to_ptr.hbm [resolvable:$true] %s116_s28 }
  0x9f   :  { %s93_s11 = sshll.u32 %s3255_s25, 4  ;;  %s2877_s12 = sshra.s32 %s92_s24, 4  ;;  %s94_s11 = int_to_ptr.vmem [resolvable:$true] %s93_s11  ;;  %s2878_s12 = int_to_ptr.hbm [resolvable:$true] %s2877_s12 }
  0xa0   :  { %s2879_s17 = scalar_lea.hbm %s2878_s12, 4  ;;  %s2881_s2 = scalar_lea.hbm %s3281_s9, 4 }
  0xa1   :  { %p2880_p12 = scmp.ne.s32.totalorder %s2878_s12, %s2879_s17  ;;  %p2882_p13 = scmp.lt.s32.totalorder %s2878_s12, %s3281_s9 }
  0xa2   :  { %p2883_p0 = scmp.lt.s32.totalorder %s2881_s2, %s2879_s17 }
  0xa4   :  { %p2884_p1 = por %p2883_p0, %p2882_p13 }
  0xa6   :  { %p2885_p2 = pnand %p2884_p1, %p2880_p12 }
  0xa8   :  { %2888 = shalt.err (!%p2885_p2)
}
  0xa9   :  { %96 = dma.hbm_to_vmem [thread:$0]  %s92_s24, 64, %s94_s11, [#allocation4]  }
  0xaa   :  { %s3256_s18 = smov [#allocation8]   ;;  %s144_s8 = sshll.u32 %s3311_s3, 4  ;;  %s3517_s8 = int_to_ptr.hbm [resolvable:$true] %s144_s8 }
  0xab   :  { %s118_s22 = sshll.u32 %s3256_s18, 4  ;;  %s2901_s13 = sshra.s32 %s3512_s28, 4  ;;  %s119_s22 = int_to_ptr.vmem [resolvable:$true] %s118_s22  ;;  %s2902_s13 = int_to_ptr.hbm [resolvable:$true] %s2901_s13 }
  0xac   :  { %s2903_s4 = scalar_lea.hbm %s2902_s13, 64  ;;  %s2905_s9 = scalar_lea.hbm %s3296_s21, 64 }
  0xad   :  { %p2904_p3 = scmp.ne.s32.totalorder %s2902_s13, %s2903_s4  ;;  %p2906_p4 = scmp.lt.s32.totalorder %s2902_s13, %s3296_s21 }
  0xae   :  { %p2907_p5 = scmp.lt.s32.totalorder %s2905_s9, %s2903_s4 }
  0xb0   :  { %p2908_p6 = por %p2907_p5, %p2906_p4 }
  0xb2   :  { %p2909_p7 = pnand %p2908_p6, %p2904_p3 }
  0xb4   :  { %2912 = shalt.err (!%p2909_p7)
}
  0xb5   :  { %124 = dma.hbm_to_vmem [thread:$0]  %s3512_s28, 1024, %s119_s22, [#allocation7], %s3246_s15, %s3246_s15, %s3247_s16  }
  0xb6   :  { %s172_s26 = sshll.u32 %s3326_s19, 4  ;;  %s3257_s0 = smov [#allocation11]   ;;  %s3527_s26 = int_to_ptr.hbm [resolvable:$true] %s172_s26 }
  0xb7   :  { %s146_s23 = sshll.u32 %s3257_s0, 4  ;;  %s2925_s21 = sshra.s32 %s3517_s8, 4  ;;  %s147_s23 = int_to_ptr.vmem [resolvable:$true] %s146_s23  ;;  %s2926_s21 = int_to_ptr.hbm [resolvable:$true] %s2925_s21 }
  0xb8   :  { %s2927_s1 = scalar_lea.hbm %s2926_s21, 64  ;;  %s2929_s24 = scalar_lea.hbm %s3311_s3, 64 }
  0xb9   :  { %p2928_p8 = scmp.ne.s32.totalorder %s2926_s21, %s2927_s1  ;;  %p2930_p9 = scmp.lt.s32.totalorder %s2926_s21, %s3311_s3 }
  0xba   :  { %p2931_p10 = scmp.lt.s32.totalorder %s2929_s24, %s2927_s1 }
  0xbc   :  { %p2932_p11 = por %p2931_p10, %p2930_p9 }
  0xbe   :  { %p2933_p12 = pnand %p2932_p11, %p2928_p8 }
  0xc0   :  { %2936 = shalt.err (!%p2933_p12)
}
  0xc1   :  { %152 = dma.hbm_to_vmem [thread:$0]  %s3517_s8, 1024, %s147_s23, [#allocation10], %s3246_s15, %s3246_s15, %s3247_s16  }
  0xc2   :  { %s3258_s7 = smov [#allocation14]   ;;  %s200_s10 = sshll.u32 %s3341_s6, 4  ;;  %s3537_s10 = int_to_ptr.hbm [resolvable:$true] %s200_s10 }
  0xc3   :  { %s174_s30 = sshll.u32 %s3258_s7, 4  ;;  %s2949_s3 = sshra.s32 %s3527_s26, 4  ;;  %s175_s30 = int_to_ptr.vmem [resolvable:$true] %s174_s30  ;;  %s2950_s3 = int_to_ptr.hbm [resolvable:$true] %s2949_s3 }
  0xc4   :  { %s2951_s28 = scalar_lea.hbm %s2950_s3, 64  ;;  %s2953_s25 = scalar_lea.hbm %s3326_s19, 64 }
  0xc5   :  { %p2952_p13 = scmp.ne.s32.totalorder %s2950_s3, %s2951_s28  ;;  %p2954_p0 = scmp.lt.s32.totalorder %s2950_s3, %s3326_s19 }
  0xc6   :  { %p2955_p1 = scmp.lt.s32.totalorder %s2953_s25, %s2951_s28 }
  0xc8   :  { %p2956_p2 = por %p2955_p1, %p2954_p0 }
  0xca   :  { %p2957_p3 = pnand %p2956_p2, %p2952_p13 }
  0xcc   :  { %2960 = shalt.err (!%p2957_p3)
}
  0xcd   :  { %180 = dma.hbm_to_vmem [thread:$0]  %s3527_s26, 1024, %s175_s30, [#allocation13], %s3246_s15, %s3246_s15, %s3247_s16  }
  0xce   :  { %s228_s11 = sshll.u32 %s3356_s27, 4  ;;  %s3259_s12 = smov [#allocation17]   ;;  %s3547_s11 = int_to_ptr.hbm [resolvable:$true] %s228_s11 }
  0xcf   :  { %s202_s17 = sshll.u32 %s3259_s12, 4  ;;  %s2973_s19 = sshra.s32 %s3537_s10, 4  ;;  %s203_s17 = int_to_ptr.vmem [resolvable:$true] %s202_s17  ;;  %s2974_s19 = int_to_ptr.hbm [resolvable:$true] %s2973_s19 }
  0xd0   :  { %s2975_s2 = scalar_lea.hbm %s2974_s19, 64  ;;  %s2977_s18 = scalar_lea.hbm %s3341_s6, 64 }
  0xd1   :  { %p2976_p4 = scmp.ne.s32.totalorder %s2974_s19, %s2975_s2  ;;  %p2978_p5 = scmp.lt.s32.totalorder %s2974_s19, %s3341_s6 }
  0xd2   :  { %p2979_p6 = scmp.lt.s32.totalorder %s2977_s18, %s2975_s2 }
  0xd4   :  { %p2980_p7 = por %p2979_p6, %p2978_p5 }
  0xd6   :  { %p2981_p8 = pnand %p2980_p7, %p2976_p4 }
  0xd8   :  { %2984 = shalt.err (!%p2981_p8)
}
  0xd9   :  { %s3652_s22 = sld [smem:[#allocation55_spill]]  ;;  %s3260_s8 = smov [#allocation20]  }
  0xda   :  { %208 = dma.hbm_to_vmem [thread:$0]  %s3537_s10, 1024, %s203_s17, [#allocation16], %s3246_s15, %s3246_s15, %s3247_s16  }
  0xdb   :  { %s230_s13 = sshll.u32 %s3260_s8, 4  ;;  %s2997_s6 = sshra.s32 %s3547_s11, 4  ;;  %s231_s13 = int_to_ptr.vmem [resolvable:$true] %s230_s13  ;;  %s2998_s6 = int_to_ptr.hbm [resolvable:$true] %s2997_s6 }
  0xdc   :  { %s2999_s9 = scalar_lea.hbm %s2998_s6, 64  ;;  %s3001_s26 = scalar_lea.hbm %s3356_s27, 64 }
  0xdd   :  { %p3000_p9 = scmp.ne.s32.totalorder %s2998_s6, %s2999_s9  ;;  %p3002_p10 = scmp.lt.s32.totalorder %s2998_s6, %s3356_s27 }
  0xde   :  { %p3003_p11 = scmp.lt.s32.totalorder %s3001_s26, %s2999_s9 }
  0xdf   :  { %s256_s4 = sshll.u32 %s3652_s22, 4  ;;  %s3557_s4 = int_to_ptr.hbm [resolvable:$true] %s256_s4 }
  0xe0   :  { %p3004_p12 = por %p3003_p11, %p3002_p10 }
  0xe2   :  { %p3005_p13 = pnand %p3004_p12, %p3000_p9 }
  0xe4   :  { %3008 = shalt.err (!%p3005_p13)
}
  0xe5   :  { %s3653_s0 = sld [smem:[#allocation57_spill]]  ;;  %s3261_s21 = smov [#allocation23]  }
  0xe6   :  { %236 = dma.hbm_to_vmem [thread:$0]  %s3547_s11, 1024, %s231_s13, [#allocation19], %s3246_s15, %s3246_s15, %s3247_s16  }
  0xe7   :  { %s258_s1 = sshll.u32 %s3261_s21, 4  ;;  %s3021_s27 = sshra.s32 %s3557_s4, 4  ;;  %s259_s1 = int_to_ptr.vmem [resolvable:$true] %s258_s1  ;;  %s3022_s27 = int_to_ptr.hbm [resolvable:$true] %s3021_s27 }
  0xe8   :  { %s3023_s24 = scalar_lea.hbm %s3022_s27, 64  ;;  %s3025_s7 = scalar_lea.hbm %s3652_s22, 64 }
  0xe9   :  { %p3024_p0 = scmp.ne.s32.totalorder %s3022_s27, %s3023_s24  ;;  %p3026_p1 = scmp.lt.s32.totalorder %s3022_s27, %s3652_s22 }
  0xea   :  { %p3027_p2 = scmp.lt.s32.totalorder %s3025_s7, %s3023_s24 }
  0xeb   :  { %s284_s23 = sshll.u32 %s3653_s0, 4  ;;  %s3567_s23 = int_to_ptr.hbm [resolvable:$true] %s284_s23 }
  0xec   :  { %p3028_p3 = por %p3027_p2, %p3026_p1 }
  0xee   :  { %p3029_p4 = pnand %p3028_p3, %p3024_p0 }
  0xf0   :  { %3032 = shalt.err (!%p3029_p4)
}
  0xf1   :  { %s3654_s30 = sld [smem:[#allocation60_spill]]  ;;  %s3262_s10 = smov [#allocation26]  }
  0xf2   :  { %264 = dma.hbm_to_vmem [thread:$0]  %s3557_s4, 1024, %s259_s1, [#allocation22], %s3246_s15, %s3246_s15, %s3247_s16  }
  0xf3   :  { %s286_s3 = sshll.u32 %s3262_s10, 4  ;;  %s3045_s25 = sshra.s32 %s3567_s23, 4  ;;  %s287_s3 = int_to_ptr.vmem [resolvable:$true] %s286_s3  ;;  %s3046_s25 = int_to_ptr.hbm [resolvable:$true] %s3045_s25 }
  0xf4   :  { %s3047_s11 = scalar_lea.hbm %s3046_s25, 64  ;;  %s3049_s12 = scalar_lea.hbm %s3653_s0, 64 }
  0xf5   :  { %p3048_p5 = scmp.ne.s32.totalorder %s3046_s25, %s3047_s11  ;;  %p3050_p6 = scmp.lt.s32.totalorder %s3046_s25, %s3653_s0 }
  0xf6   :  { %p3051_p7 = scmp.lt.s32.totalorder %s3049_s12, %s3047_s11 }
  0xf7   :  { %s314_s28 = sshll.u32 %s3654_s30, 4  ;;  %s3577_s28 = int_to_ptr.hbm [resolvable:$true] %s314_s28 }
  0xf8   :  { %p3052_p8 = por %p3051_p7, %p3050_p6 }
  0xfa   :  { %p3053_p9 = pnand %p3052_p8, %p3048_p5 }
  0xfc   :  { %3056 = shalt.err (!%p3053_p9)
}
  0xfd   :  { %s3655_s17 = sld [smem:[#allocation62_spill]]  ;;  %s3263_s2 = smov [#allocation29]  }
  0xfe   :  { %292 = dma.hbm_to_vmem [thread:$0]  %s3567_s23, 1024, %s287_s3, [#allocation25], %s3246_s15, %s3246_s15, %s3247_s16  }
  0xff   :  { %s316_s18 = sshll.u32 %s3263_s2, 4  ;;  %s3069_s22 = sshra.s32 %s3577_s28, 4  ;;  %s317_s18 = int_to_ptr.vmem [resolvable:$true] %s316_s18  ;;  %s3070_s22 = int_to_ptr.hbm [resolvable:$true] %s3069_s22 }
 0x100   :  { %s3071_s8 = scalar_lea.hbm %s3070_s22, 64  ;;  %s3073_s13 = scalar_lea.hbm %s3654_s30, 64 }
 0x101   :  { %p3072_p10 = scmp.ne.s32.totalorder %s3070_s22, %s3071_s8  ;;  %p3074_p11 = scmp.lt.s32.totalorder %s3070_s22, %s3654_s30 }
 0x102   :  { %p3075_p12 = scmp.lt.s32.totalorder %s3073_s13, %s3071_s8 }
 0x103   :  { %s329_s19 = sshll.u32 %s3655_s17, 4  ;;  %s3587_s19 = int_to_ptr.hbm [resolvable:$true] %s329_s19 }
 0x104   :  { %p3076_p13 = por %p3075_p12, %p3074_p11 }
 0x106   :  { %p3077_p0 = pnand %p3076_p13, %p3072_p10 }
 0x108   :  { %3080 = shalt.err (!%p3077_p0)
}
 0x109   :  { %322 = dma.hbm_to_vmem [thread:$0]  %s3577_s28, 1024, %s317_s18, [#allocation28], %s3246_s15, %s3246_s15, %s3247_s16  }
 0x10a   :  { %s3264_s4 = smov [#allocation30]   ;;  %s3093_s9 = sshra.s32 %s3587_s19, 4  ;;  %s3094_s9 = int_to_ptr.hbm [resolvable:$true] %s3093_s9 }
 0x10b   :  { %s331_s6 = sshll.u32 %s3264_s4, 4  ;;  %s3095_s26 = scalar_lea.hbm %s3094_s9, 64  ;;  %s332_s6 = int_to_ptr.vmem [resolvable:$true] %s331_s6 }
 0x10c   :  { %p3096_p1 = scmp.ne.s32.totalorder %s3094_s9, %s3095_s26  ;;  %s3097_s0 = scalar_lea.hbm %s3655_s17, 64 }
 0x10d   :  { %p3098_p2 = scmp.lt.s32.totalorder %s3094_s9, %s3655_s17  ;;  %p3099_p3 = scmp.lt.s32.totalorder %s3097_s0, %s3095_s26 }
 0x10f   :  { %p3100_p4 = por %p3099_p3, %p3098_p2 }
 0x111   :  { %p3101_p5 = pnand %p3100_p4, %p3096_p1 }
 0x113   :  { %3104 = shalt.err (!%p3101_p5)
}
 0x114   :  { %337 = dma.hbm_to_vmem [thread:$0]  %s3587_s19, 1024, %s332_s6, [#allocation31], %s3246_s15, %s3246_s15, %s3247_s16  }
 0x115   :  { %3189 = dma.done.wait [#allocation4], 64  }
 0x116   :  { %3190 = vsyncadd [#allocation4], 4294967232 }
 0x117   :  { %3191 = dma.done.wait [#allocation7], 2048  }
 0x118   :  { %3192 = vsyncadd [#allocation7], 4294965248 }
 0x119   :  { %3193 = dma.done.wait [#allocation10], 2048  }
 0x11a   :  { %3194 = vsyncadd [#allocation10], 4294965248 }
 0x11b   :  { %3195 = dma.done.wait [#allocation13], 2048  }
 0x11c   :  { %3196 = vsyncadd [#allocation13], 4294965248 }
 0x11d   :  { %3197 = dma.done.wait [#allocation16], 2048  }
 0x11e   :  { %3198 = vsyncadd [#allocation16], 4294965248 }
 0x11f   :  { %3199 = dma.done.wait [#allocation19], 2048  }
 0x120   :  { %3200 = vsyncadd [#allocation19], 4294965248 }
 0x121   :  { %3201 = dma.done.wait [#allocation22], 2048  }
 0x122   :  { %3202 = vsyncadd [#allocation22], 4294965248 }
 0x123   :  { %3203 = dma.done.wait [#allocation25], 2048  }
 0x124   :  { %3204 = vsyncadd [#allocation25], 4294965248 }
 0x125   :  { %3205 = dma.done.wait [#allocation28], 2048  }
 0x126   :  { %3206 = vsyncadd [#allocation28], 4294965248 }
 0x127   :  { %3207 = dma.done.wait [#allocation31], 1024  }
 0x128   :  { %3208 = vsyncadd [#allocation31], 4294966272  ;;  %v2482_v0 = vld [vmem:[#allocation6 + $0x38] sm:$0xff]  ;;  %v2481_v1 = vld [vmem:[#allocation6 + $0x30] sm:$0xff]  ;;  %s3656_s15 = sld [smem:[#allocation49_spill]]  ;;  %s3265_s28 = smov [#allocation32]  }
 0x129   :  { %481 = vmatpush.bf16.msra.mxu0 %v2482_v0  ;;  %v2490_v2 = vld [vmem:[#allocation8 + $0x38] sm:$0xff]  ;;  %v2480_v3 = vld [vmem:[#allocation6 + $0x28] sm:$0xff]  ;;  %v2489_v4 = vld [vmem:[#allocation8 + $0x30] sm:$0xff]  ;;  %s3657_s16 = sld [smem:[#allocation50_spill]]  ;;  %s1847_s25 = sshll.u32 %s3265_s28, 4  ;;  %s1848_s25 = int_to_ptr.vmem [resolvable:$true] %s1847_s25 }
 0x12a   :  { %562 = vmatpush.bf16.msra.mxu1 %v2490_v2  ;;  %v2488_v5 = vld [vmem:[#allocation8 + $0x28] sm:$0xff]  ;;  %v2479_v6 = vld [vmem:[#allocation6 + $0x20] sm:$0xff]  ;;  %v2478_v8 = vld [vmem:[#allocation6 + $0x18] sm:$0xff]  ;;  %s3658_s23 = sld [smem:[#allocation51_spill]]  ;;  %s1849_s11 = sshll.u32 %s3426_s5, 4  ;;  %s1850_s11 = int_to_ptr.hbm [resolvable:$true] %s1849_s11 }
 0x12b   :  { %v2487_v7 = vld [vmem:[#allocation8 + $0x20] sm:$0xff]  ;;  %v2486_v9 = vld [vmem:[#allocation8 + $0x18] sm:$0xff]  ;;  %v2477_v10 = vld [vmem:[#allocation6 + $0x10] sm:$0xff]  ;;  %s3659_s21 = sld [smem:[#allocation52_spill]]  ;;  %s3266_s12 = smov [#allocation33]  }
 0x12c   :  { %v2485_v11 = vld [vmem:[#allocation8 + $0x10] sm:$0xff]  ;;  %v2476_v12 = vld [vmem:[#allocation6 + $0x8] sm:$0xff]  ;;  %v2475_v13 = vld [vmem:[#allocation6] sm:$0xff]  ;;  %s3660_s1 = sld [smem:[#allocation53_spill]]  ;;  %s3620_s17 = sshll.u32 %s3266_s12, 4  ;;  %s1859_s17 = int_to_ptr.vmem [resolvable:$true] %s3620_s17 }
 0x12d   :  { %482 = vmatpush.bf16.msra.mxu0 %v2481_v1  ;;  %v412_v14 = vld [vmem:[#allocation3] sm:$0xf]  ;;  %v2484_v15 = vld [vmem:[#allocation8 + $0x8] sm:$0xff]  ;;  %v2483_v16 = vld [vmem:[#allocation8] sm:$0xff]  ;;  %s3661_s27 = sld [smem:[#allocation58_spill]]  ;;  %s1860_s19 = sshll.u32 %s3431_s29, 4  ;;  %s1861_s19 = int_to_ptr.hbm [resolvable:$true] %s1860_s19 }
 0x12e   :  { %563 = vmatpush.bf16.msra.mxu1 %v2489_v4  ;;  %v2498_v17 = vld [vmem:[#allocation9 + $0x38] sm:$0xff]  ;;  %v2497_v18 = vld [vmem:[#allocation9 + $0x30] sm:$0xff]  ;;  %v2496_v19 = vld [vmem:[#allocation9 + $0x28] sm:$0xff]  ;;  %s3662_s24 = sld [smem:[#allocation54_spill]]  ;;  %s3129_s2 = sshra.s32 %s1850_s11, 4  ;;  %s3130_s2 = int_to_ptr.hbm [resolvable:$true] %s3129_s2 }
 0x12f   :  { %644 = vmatpush.bf16.msra.mxu2 %v2498_v17  ;;  %v2495_v20 = vld [vmem:[#allocation9 + $0x20] sm:$0xff]  ;;  %v2494_v21 = vld [vmem:[#allocation9 + $0x18] sm:$0xff]  ;;  %v2493_v22 = vld [vmem:[#allocation9 + $0x10] sm:$0xff]  ;;  %s3663_s7 = sld [smem:[#allocation59_spill]]  ;;  %s3131_s18 = scalar_lea.hbm %s3130_s2, 8 }
 0x130   :  { %v2666_v23 = vld [vmem:[%s3656_s15] ss:$0 sm:$0xff]  ;;  %v2492_v24 = vld [vmem:[#allocation9 + $0x8] sm:$0xff]  ;;  %v2491_v31 = vld [vmem:[#allocation9] sm:$0xff]  ;;  %s3664_s30 = sld [smem:[#allocation48_spill]]  ;;  %p3132_p6 = scmp.ne.s32.totalorder %s3130_s2, %s3131_s18 }
 0x131   :  { %483 = vmatpush.bf16.msra.mxu0 %v2480_v3  ;;  %v2506_v32 = vld [vmem:[#allocation11 + $0x38] sm:$0xff]  ;;  %v2505_v33 = vld [vmem:[#allocation11 + $0x30] sm:$0xff]  ;;  %v2504_v34 = vld [vmem:[#allocation11 + $0x28] sm:$0xff]  ;;  %s3665_s10 = sld [smem:[#allocation61_spill]]  ;;  %s3133_s22 = scalar_lea.hbm %s3426_s5, 8 }
 0x132   :  { %564 = vmatpush.bf16.msra.mxu1 %v2488_v5  ;;  %725 = vmatpush.bf16.msra.mxu3 %v2506_v32  ;;  %v2503_v35 = vld [vmem:[#allocation11 + $0x20] sm:$0xff]  ;;  %v2502_v36 = vld [vmem:[#allocation11 + $0x18] sm:$0xff]  ;;  %v2501_v37 = vld [vmem:[#allocation11 + $0x10] sm:$0xff]  ;;  %s3666_s3 = sld [smem:[#allocation56_spill]]  ;;  %p3134_p7 = scmp.lt.s32.totalorder %s3130_s2, %s3426_s5 }
 0x133   :  { %645 = vmatpush.bf16.msra.mxu2 %v2497_v18  ;;  %v2500_v41 = vld [vmem:[#allocation11 + $0x8] sm:$0xff]  ;;  %v2499_v42 = vld [vmem:[#allocation11] sm:$0xff]  ;;  %v2514_v43 = vld [vmem:[#allocation12 + $0x38] sm:$0xff]  ;;  %p3135_p8 = scmp.lt.s32.totalorder %s3133_s22, %s3131_s18 }
 0x134   :  { %v2513_v44 = vld [vmem:[#allocation12 + $0x30] sm:$0xff]  ;;  %v2512_v45 = vld [vmem:[#allocation12 + $0x28] sm:$0xff]  ;;  %v2511_v46 = vld [vmem:[#allocation12 + $0x20] sm:$0xff] }
 0x135   :  { %484 = vmatpush.bf16.msra.mxu0 %v2479_v6  ;;  %v2510_v47 = vld [vmem:[#allocation12 + $0x18] sm:$0xff]  ;;  %v2509_v48 = vld [vmem:[#allocation12 + $0x10] sm:$0xff]  ;;  %v2508_v50 = vld [vmem:[#allocation12 + $0x8] sm:$0xff]  ;;  %p3136_p9 = por %p3135_p8, %p3134_p7 }
 0x136   :  { %565 = vmatpush.bf16.msra.mxu1 %v2487_v7  ;;  %726 = vmatpush.bf16.msra.mxu3 %v2505_v33  ;;  %v2667_v49 = vld [vmem:[%s3657_s16] ss:$0 sm:$0xff]  ;;  %v2507_v57 = vld [vmem:[#allocation12] sm:$0xff]  ;;  %v2521_v59 = vld [vmem:[#allocation14 + $0x30] sm:$0xff] }
 0x137   :  { %646 = vmatpush.bf16.msra.mxu2 %v2496_v19  ;;  %v2522_v58 = vld [vmem:[#allocation14 + $0x38] sm:$0xff]  ;;  %v2520_v60 = vld [vmem:[#allocation14 + $0x28] sm:$0xff]  ;;  %v2519_v61 = vld [vmem:[#allocation14 + $0x20] sm:$0xff]  ;;  %p3137_p10 = pnand %p3136_p9, %p3132_p6 }
 0x138   :  { %v2518_v62 = vld [vmem:[#allocation14 + $0x18] sm:$0xff]  ;;  %v2517_v63 = vld [vmem:[#allocation14 + $0x10] sm:$0xff]  ;;  %v2516_v3 = vld [vmem:[#allocation14 + $0x8] sm:$0xff] }
 0x139   :  { %485 = vmatpush.bf16.msra.mxu0 %v2478_v8  ;;  %v2515_v4 = vld [vmem:[#allocation14] sm:$0xff]  ;;  %v2530_v5 = vld [vmem:[#allocation15 + $0x38] sm:$0xff]  ;;  %v2529_v6 = vld [vmem:[#allocation15 + $0x30] sm:$0xff] }
 0x13a   :  { %566 = vmatpush.bf16.msra.mxu1 %v2486_v9  ;;  %727 = vmatpush.bf16.msra.mxu3 %v2504_v34  ;;  %v2528_v7 = vld [vmem:[#allocation15 + $0x28] sm:$0xff]  ;;  %v2527_v8 = vld [vmem:[#allocation15 + $0x20] sm:$0xff]  ;;  %v2526_v9 = vld [vmem:[#allocation15 + $0x18] sm:$0xff] }
 0x13b   :  { %647 = vmatpush.bf16.msra.mxu2 %v2495_v20  ;;  %v2523_v19 = vld [vmem:[#allocation15] sm:$0xff]  ;;  %v2538_v20 = vld [vmem:[#allocation17 + $0x38] sm:$0xff]  ;;  %v2545_v32 = vld [vmem:[#allocation18 + $0x30] sm:$0xff] }
 0x13c   :  { %v2544_v33 = vld [vmem:[#allocation18 + $0x28] sm:$0xff]  ;;  %v2543_v34 = vld [vmem:[#allocation18 + $0x20] sm:$0xff] }
 0x13d   :  { %486 = vmatpush.bf16.msra.mxu0 %v2477_v10  ;;  %v2525_v10 = vld [vmem:[#allocation15 + $0x10] sm:$0xff] }
 0x13e   :  { %567 = vmatpush.bf16.msra.mxu1 %v2485_v11  ;;  %728 = vmatpush.bf16.msra.mxu3 %v2503_v35  ;;  %v2668_v11 = vld [vmem:[%s3658_s23] ss:$0 sm:$0xff] }
 0x13f   :  { %648 = vmatpush.bf16.msra.mxu2 %v2494_v21  ;;  %v2537_v21 = vld [vmem:[#allocation17 + $0x30] sm:$0xff]  ;;  %v2542_v35 = vld [vmem:[#allocation18 + $0x18] sm:$0xff] }
 0x141   :  { %487 = vmatpush.bf16.msra.mxu0 %v2476_v12  ;;  %v2524_v12 = vld [vmem:[#allocation15 + $0x8] sm:$0xff] }
 0x142   :  { %568 = vmatpush.bf16.msra.mxu1 %v2484_v15  ;;  %729 = vmatpush.bf16.msra.mxu3 %v2502_v36  ;;  %v2541_v36 = vld [vmem:[#allocation18 + $0x10] sm:$0xff] }
 0x143   :  { %649 = vmatpush.bf16.msra.mxu2 %v2493_v22  ;;  %v2536_v22 = vld [vmem:[#allocation17 + $0x28] sm:$0xff] }
 0x145   :  { %488 = vmatpush.bf16.msra.mxu0 %v2475_v13 }
 0x146   :  { %569 = vmatpush.bf16.msra.mxu1 %v2483_v16  ;;  %730 = vmatpush.bf16.msra.mxu3 %v2501_v37  ;;  %v2669_v37 = vld [vmem:[%s3659_s21] ss:$0 sm:$0xff] }
 0x147   :  { %650 = vmatpush.bf16.msra.mxu2 %v2492_v24  ;;  %v2534_v24 = vld [vmem:[#allocation17 + $0x18] sm:$0xff] }
 0x148   :  { %489 = vmatmul.bf16.vlgmr.msra.gmra.mxu0 %v412_v14 }
 0x149   :  { %807 = vmatpush.bf16.msrb.mxu0 %v2514_v43 }
 0x14a   :  { %731 = vmatpush.bf16.msra.mxu3 %v2500_v41  ;;  %888 = vmatpush.bf16.msrb.mxu1 %v2522_v58 }
 0x14b   :  { %651 = vmatpush.bf16.msra.mxu2 %v2491_v31  ;;  %v2546_v31 = vld [vmem:[#allocation18 + $0x38] sm:$0xff] }
 0x14d   :  { %808 = vmatpush.bf16.msrb.mxu0 %v2513_v44 }
 0x14e   :  { %732 = vmatpush.bf16.msra.mxu3 %v2499_v42  ;;  %889 = vmatpush.bf16.msrb.mxu1 %v2521_v59  ;;  %v2584_v59 = vld [vmem:[#allocation26 + $0x28] sm:$0xff] }
 0x14f   :  { %970 = vmatpush.bf16.msrb.mxu2 %v2530_v5 }
 0x151   :  { %809 = vmatpush.bf16.msrb.mxu0 %v2512_v45  ;;  %v2539_v45 = vld [vmem:[#allocation18] sm:$0xff] }
 0x152   :  { %890 = vmatpush.bf16.msrb.mxu1 %v2520_v60  ;;  %1051 = vmatpush.bf16.msrb.mxu3 %v2538_v20  ;;  %v2583_v60 = vld [vmem:[#allocation26 + $0x20] sm:$0xff]  ;;  %v2590_v20 = vld [vmem:[#allocation27 + $0x18] sm:$0xff] }
 0x153   :  { %971 = vmatpush.bf16.msrb.mxu2 %v2529_v6 }
 0x155   :  { %810 = vmatpush.bf16.msrb.mxu0 %v2511_v46  ;;  %v2554_v46 = vld [vmem:[#allocation20 + $0x38] sm:$0xff] }
 0x156   :  { %891 = vmatpush.bf16.msrb.mxu1 %v2519_v61  ;;  %1052 = vmatpush.bf16.msrb.mxu3 %v2537_v21  ;;  %v2582_v61 = vld [vmem:[#allocation26 + $0x18] sm:$0xff]  ;;  %v2589_v21 = vld [vmem:[#allocation27 + $0x10] sm:$0xff] }
 0x157   :  { %972 = vmatpush.bf16.msrb.mxu2 %v2528_v7  ;;  %v2559_v7 = vld [vmem:[#allocation21 + $0x20] sm:$0xff] }
 0x159   :  { %811 = vmatpush.bf16.msrb.mxu0 %v2510_v47  ;;  %v2553_v47 = vld [vmem:[#allocation20 + $0x30] sm:$0xff] }
 0x15a   :  { %892 = vmatpush.bf16.msrb.mxu1 %v2518_v62  ;;  %1053 = vmatpush.bf16.msrb.mxu3 %v2536_v22  ;;  %v2581_v62 = vld [vmem:[#allocation26 + $0x10] sm:$0xff]  ;;  %v2588_v22 = vld [vmem:[#allocation27 + $0x8] sm:$0xff] }
 0x15b   :  { %973 = vmatpush.bf16.msrb.mxu2 %v2527_v8 }
 0x15d   :  { %812 = vmatpush.bf16.msrb.mxu0 %v2509_v48  ;;  %v2552_v48 = vld [vmem:[#allocation20 + $0x28] sm:$0xff] }
 0x15e   :  { %893 = vmatpush.bf16.msrb.mxu1 %v2517_v63  ;;  %v2580_v63 = vld [vmem:[#allocation26 + $0x8] sm:$0xff] }
 0x15f   :  { %974 = vmatpush.bf16.msrb.mxu2 %v2526_v9 }
 0x161   :  { %813 = vmatpush.bf16.msrb.mxu0 %v2508_v50  ;;  %v2550_v50 = vld [vmem:[#allocation20 + $0x18] sm:$0xff] }
 0x162   :  { %894 = vmatpush.bf16.msrb.mxu1 %v2516_v3  ;;  %v2670_v3 = vld [vmem:[%s3660_s1] ss:$0 sm:$0xff] }
 0x163   :  { %975 = vmatpush.bf16.msrb.mxu2 %v2525_v10 }
 0x165   :  { %814 = vmatpush.bf16.msrb.mxu0 %v2507_v57  ;;  %v2585_v57 = vld [vmem:[#allocation26 + $0x30] sm:$0xff] }
 0x166   :  { %895 = vmatpush.bf16.msrb.mxu1 %v2515_v4  ;;  %v2560_v4 = vld [vmem:[#allocation21 + $0x28] sm:$0xff] }
 0x167   :  { %976 = vmatpush.bf16.msrb.mxu2 %v2524_v12 }
 0x169   :  { %1133 = vmatpush.bf16.msra.mxu0 %v2546_v31 }
 0x16b   :  { %977 = vmatpush.bf16.msrb.mxu2 %v2523_v19  ;;  %v2591_v19 = vld [vmem:[#allocation27 + $0x20] sm:$0xff] }
 0x16d   :  { %1134 = vmatpush.bf16.msra.mxu0 %v2545_v32  ;;  %v2565_v32 = vld [vmem:[#allocation23 + $0x10] sm:$0xff] }
 0x171   :  { %1135 = vmatpush.bf16.msra.mxu0 %v2544_v33  ;;  %v2671_v33 = vld [vmem:[%s3661_s27] ss:$0 sm:$0xff] }
 0x175   :  { %1136 = vmatpush.bf16.msra.mxu0 %v2543_v34  ;;  %v2564_v34 = vld [vmem:[#allocation23 + $0x8] sm:$0xff] }
 0x179   :  { %1137 = vmatpush.bf16.msra.mxu0 %v2542_v35 }
 0x17d   :  { %1138 = vmatpush.bf16.msra.mxu0 %v2541_v36 }
 0x1c5   :  { %v490_v25 = vpop.f32.mrf.mxu0 }
 0x1c6   :  { %v491_v26 = vadd.f32 %v2666_v23, %v490_v25  ;;  %v2535_v23 = vld [vmem:[#allocation17 + $0x20] sm:$0xff]  ;;  %v2533_v25 = vld [vmem:[#allocation17 + $0x10] sm:$0xff] }
 0x1c7   :  { %1054 = vmatpush.bf16.msrb.mxu3 %v2535_v23  ;;  %v2587_v23 = vld [vmem:[#allocation27] sm:$0xff] }
 0x1c8   :  { %v495_v27 = vmul.f32 0.2, %v491_v26  ;;  %vm494_vm0 = vcmp.gt.f32.partialorder %v491_v26, 0.0 }
 0x1ca   :  { %v496_v28 = vsel %vm494_vm0, %v491_v26, %v495_v27 }
 0x1cb   :  { %v497_v29 = vpack.c.bf16 %v496_v28, %v496_v28  ;;  %1055 = vmatpush.bf16.msrb.mxu3 %v2534_v24  ;;  %v2570_v24 = vld [vmem:[#allocation23 + $0x38] sm:$0xff] }
 0x1cd   :  { %v492_v30 = vpop.f32.mrf.mxu0  ;;  %570 = vmatmul.bf16.vlgmr.msra.gmra.mxu1 %v497_v29  ;;  %v2532_v29 = vld [vmem:[#allocation17 + $0x8] sm:$0xff] }
 0x1ce   :  { %v2531_v30 = vld [vmem:[#allocation17] sm:$0xff]  ;;  %1214 = vmatpush.bf16.msra.mxu1 %v2554_v46 }
 0x1cf   :  { %1056 = vmatpush.bf16.msrb.mxu3 %v2533_v25  ;;  %v2569_v25 = vld [vmem:[#allocation23 + $0x30] sm:$0xff]  ;;  %v2599_v46 = vld [vmem:[#allocation29 + $0x20] sm:$0xff] }
 0x1d2   :  { %1215 = vmatpush.bf16.msra.mxu1 %v2553_v47  ;;  %v2598_v47 = vld [vmem:[#allocation29 + $0x18] sm:$0xff] }
 0x1d3   :  { %1057 = vmatpush.bf16.msrb.mxu3 %v2532_v29  ;;  %v2567_v29 = vld [vmem:[#allocation23 + $0x20] sm:$0xff] }
 0x1d6   :  { %1216 = vmatpush.bf16.msra.mxu1 %v2552_v48  ;;  %v2597_v48 = vld [vmem:[#allocation29 + $0x10] sm:$0xff] }
 0x1d7   :  { %1058 = vmatpush.bf16.msrb.mxu3 %v2531_v30  ;;  %v2566_v30 = vld [vmem:[#allocation23 + $0x18] sm:$0xff] }
 0x24a   :  { %v571_v38 = vpop.f32.mrf.mxu1 }
 0x24b   :  { %v575_v39 = vpack.c.bf16 %v571_v38, %v571_v38  ;;  %v2540_v38 = vld [vmem:[#allocation18 + $0x8] sm:$0xff] }
 0x24c   :  { %1139 = vmatpush.bf16.msra.mxu0 %v2540_v38 }
 0x24d   :  { %652 = vmatmul.bf16.vlgmr.msra.gmra.mxu2 %v575_v39 }
 0x250   :  { %1140 = vmatpush.bf16.msra.mxu0 %v2539_v45  ;;  %v2600_v45 = vld [vmem:[#allocation29 + $0x28] sm:$0xff] }
 0x252   :  { %v573_v40 = vpop.f32.mrf.mxu1 }
 0x2d0   :  { %v653_v51 = vpop.f32.mrf.mxu2 }
 0x2d1   :  { %v654_v52 = vadd.f32 %v2667_v49, %v653_v51  ;;  %v2551_v49 = vld [vmem:[#allocation20 + $0x20] sm:$0xff]  ;;  %v2549_v51 = vld [vmem:[#allocation20 + $0x10] sm:$0xff] }
 0x2d2   :  { %1217 = vmatpush.bf16.msra.mxu1 %v2551_v49  ;;  %v2596_v49 = vld [vmem:[#allocation29 + $0x8] sm:$0xff] }
 0x2d3   :  { %v658_v53 = vmul.f32 0.2, %v654_v52  ;;  %vm657_vm1 = vcmp.gt.f32.partialorder %v654_v52, 0.0 }
 0x2d5   :  { %v659_v54 = vsel %vm657_vm1, %v654_v52, %v658_v53  ;;  %v2548_v52 = vld [vmem:[#allocation20 + $0x8] sm:$0xff] }
 0x2d6   :  { %v660_v55 = vpack.c.bf16 %v659_v54, %v659_v54  ;;  %1218 = vmatpush.bf16.msra.mxu1 %v2550_v50  ;;  %v2595_v50 = vld [vmem:[#allocation29] sm:$0xff] }
 0x2d8   :  { %v655_v56 = vpop.f32.mrf.mxu2  ;;  %733 = vmatmul.bf16.vlgmr.msra.gmra.mxu3 %v660_v55  ;;  %v2547_v55 = vld [vmem:[#allocation20] sm:$0xff] }
 0x2d9   :  { %v2586_v56 = vld [vmem:[#allocation26 + $0x38] sm:$0xff]  ;;  %1377 = vmatpush.bf16.msra.mxu3 %v2570_v24 }
 0x2da   :  { %1219 = vmatpush.bf16.msra.mxu1 %v2549_v51  ;;  %v2672_v51 = vld [vmem:[%s3662_s24] ss:$0 sm:$0xff] }
 0x2dd   :  { %1378 = vmatpush.bf16.msra.mxu3 %v2569_v25 }
 0x2de   :  { %1220 = vmatpush.bf16.msra.mxu1 %v2548_v52  ;;  %v2578_v52 = vld [vmem:[#allocation24 + $0x38] sm:$0xff] }
 0x2e2   :  { %1221 = vmatpush.bf16.msra.mxu1 %v2547_v55 }
 0x35b   :  { %v734_v0 = vpop.f32.mrf.mxu3 }
 0x35c   :  { %v738_v1 = vpack.c.bf16 %v734_v0, %v734_v0  ;;  %v2579_v0 = vld [vmem:[#allocation26] sm:$0xff] }
 0x35e   :  { %815 = vmatmul.bf16.vlgmr.msrb.gmra.mxu0 %v738_v1  ;;  %v2562_v1 = vld [vmem:[#allocation21 + $0x38] sm:$0xff] }
 0x35f   :  { %1296 = vmatpush.bf16.msra.mxu2 %v2562_v1  ;;  %1459 = vmatpush.bf16.msrb.mxu0 %v2578_v52  ;;  %v2572_v1 = vld [vmem:[#allocation24 + $0x8] sm:$0xff] }
 0x363   :  { %v736_v2 = vpop.f32.mrf.mxu3 }
 0x364   :  { %v2561_v2 = vld [vmem:[#allocation21 + $0x30] sm:$0xff] }
 0x365   :  { %1297 = vmatpush.bf16.msra.mxu2 %v2561_v2 }
 0x369   :  { %1298 = vmatpush.bf16.msra.mxu2 %v2560_v4  ;;  %v2571_v4 = vld [vmem:[#allocation24] sm:$0xff] }
 0x36d   :  { %1299 = vmatpush.bf16.msra.mxu2 %v2559_v7 }
 0x3db   :  { %v816_v13 = vpop.f32.mrf.mxu0 }
 0x3dc   :  { %v817_v14 = vadd.f32 %v2668_v11, %v816_v13  ;;  %v2558_v11 = vld [vmem:[#allocation21 + $0x18] sm:$0xff]  ;;  %v2557_v13 = vld [vmem:[#allocation21 + $0x10] sm:$0xff] }
 0x3dd   :  { %1300 = vmatpush.bf16.msra.mxu2 %v2558_v11  ;;  %v2605_v11 = vld [vmem:[#allocation30 + $0x10] sm:$0xff] }
 0x3de   :  { %vm820_vm2 = vcmp.gt.f32.partialorder %v817_v14, 0.0  ;;  %v821_v15 = vmul.f32 0.2, %v817_v14 }
 0x3e0   :  { %v822_v16 = vsel %vm820_vm2, %v817_v14, %v821_v15  ;;  %v2556_v14 = vld [vmem:[#allocation21 + $0x8] sm:$0xff]  ;;  %v2555_v15 = vld [vmem:[#allocation21] sm:$0xff] }
 0x3e1   :  { %v823_v17 = vpack.c.bf16 %v822_v16, %v822_v16  ;;  %1301 = vmatpush.bf16.msra.mxu2 %v2557_v13  ;;  %v2594_v16 = vld [vmem:[#allocation27 + $0x38] sm:$0xff] }
 0x3e3   :  { %v818_v18 = vpop.f32.mrf.mxu0  ;;  %896 = vmatmul.bf16.vlgmr.msrb.gmra.mxu1 %v823_v17  ;;  %v2593_v17 = vld [vmem:[#allocation27 + $0x30] sm:$0xff] }
 0x3e4   :  { %1544 = vmatpush.bf16.msrb.mxu1 %v2586_v56  ;;  %v2592_v18 = vld [vmem:[#allocation27 + $0x28] sm:$0xff] }
 0x3e5   :  { %1302 = vmatpush.bf16.msra.mxu2 %v2556_v14 }
 0x3e8   :  { %1545 = vmatpush.bf16.msrb.mxu1 %v2585_v57  ;;  %v2576_v57 = vld [vmem:[#allocation24 + $0x28] sm:$0xff] }
 0x3e9   :  { %1303 = vmatpush.bf16.msra.mxu2 %v2555_v15 }
 0x3ec   :  { %1546 = vmatpush.bf16.msrb.mxu1 %v2584_v59 }
 0x3f0   :  { %1547 = vmatpush.bf16.msrb.mxu1 %v2583_v60  ;;  %v2575_v60 = vld [vmem:[#allocation24 + $0x20] sm:$0xff] }
 0x3f4   :  { %1548 = vmatpush.bf16.msrb.mxu1 %v2582_v61 }
 0x3f8   :  { %1549 = vmatpush.bf16.msrb.mxu1 %v2581_v62  ;;  %v2574_v62 = vld [vmem:[#allocation24 + $0x18] sm:$0xff] }
 0x3fc   :  { %1550 = vmatpush.bf16.msrb.mxu1 %v2580_v63  ;;  %v2573_v63 = vld [vmem:[#allocation24 + $0x10] sm:$0xff] }
 0x400   :  { %1551 = vmatpush.bf16.msrb.mxu1 %v2579_v0  ;;  %v2673_v0 = vld [vmem:[%s3663_s7] ss:$0 sm:$0xff] }
 0x460   :  { %v897_v26 = vpop.f32.mrf.mxu1 }
 0x461   :  { %v901_v27 = vpack.c.bf16 %v897_v26, %v897_v26  ;;  %v2568_v26 = vld [vmem:[#allocation23 + $0x28] sm:$0xff] }
 0x462   :  { %1379 = vmatpush.bf16.msra.mxu3 %v2568_v26 }
 0x463   :  { %978 = vmatmul.bf16.vlgmr.msrb.gmra.mxu2 %v901_v27 }
 0x464   :  { %1629 = vmatpush.bf16.msrb.mxu2 %v2594_v16 }
 0x466   :  { %1380 = vmatpush.bf16.msra.mxu3 %v2567_v29  ;;  %v2675_v29 = vld [vmem:[%s3666_s3] ss:$0 sm:$0xff] }
 0x468   :  { %v899_v28 = vpop.f32.mrf.mxu1  ;;  %1630 = vmatpush.bf16.msrb.mxu2 %v2593_v17 }
 0x46a   :  { %1381 = vmatpush.bf16.msra.mxu3 %v2566_v30 }
 0x46c   :  { %1631 = vmatpush.bf16.msrb.mxu2 %v2592_v18 }
 0x46e   :  { %1382 = vmatpush.bf16.msra.mxu3 %v2565_v32 }
 0x470   :  { %1632 = vmatpush.bf16.msrb.mxu2 %v2591_v19 }
 0x472   :  { %1383 = vmatpush.bf16.msra.mxu3 %v2564_v34 }
 0x474   :  { %1633 = vmatpush.bf16.msrb.mxu2 %v2590_v20  ;;  %v1730_v20 = vstv %s3664_s30 }
 0x478   :  { %1634 = vmatpush.bf16.msrb.mxu2 %v2589_v21  ;;  %v2674_v21 = vld [vmem:[%s3665_s10] ss:$0 sm:$0xff] }
 0x47c   :  { %1635 = vmatpush.bf16.msrb.mxu2 %v2588_v22 }
 0x480   :  { %1636 = vmatpush.bf16.msrb.mxu2 %v2587_v23 }
 0x4e6   :  { %v979_v39 = vpop.f32.mrf.mxu2 }
 0x4e7   :  { %v980_v40 = vadd.f32 %v2669_v37, %v979_v39  ;;  %v2563_v37 = vld [vmem:[#allocation23] sm:$0xff]  ;;  %v2602_v39 = vld [vmem:[#allocation29 + $0x38] sm:$0xff] }
 0x4e8   :  { %1384 = vmatpush.bf16.msra.mxu3 %v2563_v37 }
 0x4e9   :  { %vm983_vm3 = vcmp.gt.f32.partialorder %v980_v40, 0.0  ;;  %v984_v41 = vmul.f32 0.2, %v980_v40 }
 0x4eb   :  { %v985_v42 = vsel %vm983_vm3, %v980_v40, %v984_v41 }
 0x4ec   :  { %v3607_v43 = vpack.c.bf16 %v985_v42, %v985_v42  ;;  %v2601_v42 = vld [vmem:[#allocation29 + $0x30] sm:$0xff] }
 0x4ee   :  { %v981_v44 = vpop.f32.mrf.mxu2  ;;  %1059 = vmatmul.bf16.vlgmr.msrb.gmra.mxu3 %v3607_v43 }
 0x4ef   :  { %1717 = vmatpush.bf16.msrb.mxu3 %v2602_v39 }
 0x4f3   :  { %1718 = vmatpush.bf16.msrb.mxu3 %v2601_v42 }
 0x4f7   :  { %1719 = vmatpush.bf16.msrb.mxu3 %v2600_v45 }
 0x4fb   :  { %1720 = vmatpush.bf16.msrb.mxu3 %v2599_v46 }
 0x4ff   :  { %1721 = vmatpush.bf16.msrb.mxu3 %v2598_v47 }
 0x503   :  { %1722 = vmatpush.bf16.msrb.mxu3 %v2597_v48 }
 0x507   :  { %1723 = vmatpush.bf16.msrb.mxu3 %v2596_v49 }
 0x50b   :  { %1724 = vmatpush.bf16.msrb.mxu3 %v2595_v50 }
 0x571   :  { %v1060_v53 = vpop.f32.mrf.mxu3 }
 0x572   :  { %v1064_v54 = vpack.c.bf16 %v1060_v53, %v1060_v53  ;;  %v2577_v53 = vld [vmem:[#allocation24 + $0x30] sm:$0xff] }
 0x573   :  { %1460 = vmatpush.bf16.msrb.mxu0 %v2577_v53 }
 0x574   :  { %1141 = vmatmul.bf16.vlgmr.msra.gmra.mxu0 %v1064_v54 }
 0x577   :  { %1461 = vmatpush.bf16.msrb.mxu0 %v2576_v57 }
 0x579   :  { %v1062_v58 = vpop.f32.mrf.mxu3 }
 0x57b   :  { %1462 = vmatpush.bf16.msrb.mxu0 %v2575_v60 }
 0x57f   :  { %1463 = vmatpush.bf16.msrb.mxu0 %v2574_v62 }
 0x583   :  { %1464 = vmatpush.bf16.msrb.mxu0 %v2573_v63 }
 0x587   :  { %1465 = vmatpush.bf16.msrb.mxu0 %v2572_v1 }
 0x58b   :  { %1466 = vmatpush.bf16.msrb.mxu0 %v2571_v4 }
 0x5f1   :  { %v1142_v5 = vpop.f32.mrf.mxu0 }
 0x5f2   :  { %v1143_v6 = vadd.f32 %v2670_v3, %v1142_v5  ;;  %v2610_v5 = vld [vmem:[#allocation30 + $0x38] sm:$0xff] }
 0x5f3   :  { %1809 = vmatpush.bf16.msra.mxu0 %v2610_v5 }
 0x5f4   :  { %vm1146_vm4 = vcmp.gt.f32.partialorder %v1143_v6, 0.0  ;;  %v1147_v8 = vmul.f32 0.2, %v1143_v6 }
 0x5f6   :  { %v1148_v9 = vsel %vm1146_vm4, %v1143_v6, %v1147_v8  ;;  %v2609_v6 = vld [vmem:[#allocation30 + $0x30] sm:$0xff]  ;;  %v2608_v8 = vld [vmem:[#allocation30 + $0x28] sm:$0xff] }
 0x5f7   :  { %v1149_v10 = vpack.c.bf16 %v1148_v9, %v1148_v9  ;;  %1810 = vmatpush.bf16.msra.mxu0 %v2609_v6  ;;  %v2607_v9 = vld [vmem:[#allocation30 + $0x20] sm:$0xff] }
 0x5f9   :  { %v1144_v12 = vpop.f32.mrf.mxu0  ;;  %1222 = vmatmul.bf16.vlgmr.msra.gmra.mxu1 %v1149_v10  ;;  %v2606_v10 = vld [vmem:[#allocation30 + $0x18] sm:$0xff] }
 0x5fa   :  { %v2604_v12 = vld [vmem:[#allocation30 + $0x8] sm:$0xff] }
 0x5fb   :  { %1811 = vmatpush.bf16.msra.mxu0 %v2608_v8 }
 0x5ff   :  { %1812 = vmatpush.bf16.msra.mxu0 %v2607_v9 }
 0x603   :  { %1813 = vmatpush.bf16.msra.mxu0 %v2606_v10 }
 0x607   :  { %1814 = vmatpush.bf16.msra.mxu0 %v2605_v11 }
 0x609   :  { %1552 = vmatmul.bf16.vlgmr.msrb.gmra.mxu1 %v3607_v43 }
 0x60b   :  { %1815 = vmatpush.bf16.msra.mxu0 %v2604_v12 }
 0x676   :  { %v1223_v27 = vpop.f32.mrf.mxu1 }
 0x677   :  { %v1227_v28 = vpack.c.bf16 %v1223_v27, %v1223_v27 }
 0x679   :  { %1304 = vmatmul.bf16.vlgmr.msra.gmra.mxu2 %v1227_v28 }
 0x67e   :  { %v1225_v31 = vpop.f32.mrf.mxu1 }
 0x686   :  { %v1553_v35 = vpop.f32.mrf.mxu1 }
 0x687   :  { %v1554_v36 = vadd.f32 %v2671_v33, %v1553_v35 }
 0x689   :  { %vm1557_vm5 = vcmp.gt.f32.partialorder %v1554_v36, 0.0  ;;  %v1558_v38 = vmul.f32 0.2, %v1554_v36 }
 0x68b   :  { %v1559_v40 = vsel %vm1557_vm5, %v1554_v36, %v1558_v38 }
 0x68c   :  { %v1560_v41 = vpack.c.bf16 %v1559_v40, %v1559_v40 }
 0x68e   :  { %v1555_v44 = vpop.f32.mrf.mxu1  ;;  %1637 = vmatmul.bf16.vlgmr.msrb.gmra.mxu2 %v1560_v41 }
 0x6fc   :  { %v1305_v54 = vpop.f32.mrf.mxu2 }
 0x6fd   :  { %v1306_v55 = vadd.f32 %v2672_v51, %v1305_v54 }
 0x6ff   :  { %vm1309_vm6 = vcmp.gt.f32.partialorder %v1306_v55, 0.0  ;;  %v1310_v56 = vmul.f32 0.2, %v1306_v55 }
 0x701   :  { %v1311_v58 = vsel %vm1309_vm6, %v1306_v55, %v1310_v56 }
 0x702   :  { %v1312_v59 = vpack.c.bf16 %v1311_v58, %v1311_v58 }
 0x704   :  { %v1307_v61 = vpop.f32.mrf.mxu2  ;;  %1385 = vmatmul.bf16.vlgmr.msra.gmra.mxu3 %v1312_v59 }
 0x711   :  { %v1638_v2 = vpop.f32.mrf.mxu2 }
 0x712   :  { %v1639_v3 = vadd.f32 %v2673_v0, %v1638_v2 }
 0x714   :  { %1725 = vmatmul.bf16.vlgmr.msrb.gmra.mxu3 %v3607_v43  ;;  %1642 = vmax.xlane.f32.xlu0 %v1639_v3  ;;  %v2603_v43 = vld [vmem:[#allocation30] sm:$0xff] }
 0x715   :  { %1816 = vmatpush.bf16.msra.mxu0 %v2603_v43 }
 0x719   :  { %v1640_v7 = vpop.f32.mrf.mxu2 }
 0x787   :  { %v1386_v13 = vpop.f32.mrf.mxu3  ;;  %v1643_v14 = vpop.xlane.xlu0 %1642 }
 0x788   :  { %v1390_v15 = vpack.c.bf16 %v1386_v13, %v1386_v13  ;;  %v1644_v16 = vsub.f32 %v1639_v3, %v1643_v14 }
 0x78a   :  { %v1645_v17 = vmul.f32 1.442695, %v1644_v16  ;;  %1467 = vmatmul.bf16.vlgmr.msrb.gmra.mxu0 %v1390_v15 }
 0x78c   :  { %2677 = vpow2.f32 %v1645_v17 }
 0x78f   :  { %v1388_v18 = vpop.f32.mrf.mxu3 }
 0x792   :  { %v2678_v19 = vpop.eup %2677 }
 0x793   :  { %1647 = vadd.xlane.f32.xlu0 %v2678_v19 }
 0x797   :  { %v1726_v22 = vpop.f32.mrf.mxu3 }
 0x798   :  { %v1731_v23 = vmul.f32 %v1730_v20, %v1726_v22 }
 0x79a   :  { %v1736_v24 = vadd.f32 %v2674_v21, %v1731_v23 }
 0x79c   :  { %vm1737_vm7 = vcmp.gt.f32.partialorder %v1736_v24, 0.0  ;;  %v1738_v25 = vmul.f32 0.2, %v1736_v24 }
 0x79e   :  { %v1739_v26 = vsel %vm1737_vm7, %v1736_v24, %v1738_v25 }
 0x79f   :  { %v1740_v27 = vpack.c.bf16 %v1739_v26, %v1739_v26  ;;  %v1728_v28 = vpop.f32.mrf.mxu3 }
 0x7a1   :  { %1817 = vmatmul.bf16.vlgmr.msra.gmra.mxu0 %v1740_v27 }
 0x806   :  { %v1648_v30 = vpop.xlane.xlu0 %1647 }
 0x807   :  { %2679 = vrcp.f32 %v1648_v30  ;;  %v1468_v31 = vpop.f32.mrf.mxu0 }
 0x808   :  { %v1469_v32 = vadd.f32 %v2675_v29, %v1468_v31 }
 0x80a   :  { %vm1472_vm8 = vcmp.gt.f32.partialorder %v1469_v32, 0.0  ;;  %v1473_v33 = vmul.f32 0.2, %v1469_v32 }
 0x80c   :  { %v1474_v34 = vsel %vm1472_vm8, %v1469_v32, %v1473_v33 }
 0x80d   :  { %v2680_v35 = vpop.eup %2679  ;;  %1475 = vst [vmem:[#allocation32] sm:$0xff] %v1474_v34 }
 0x80e   :  { %v1650_v36 = vmul.f32 %v2680_v35, %v2678_v19 }
 0x80f   :  { %3140 = shalt.err (!%p3137_p10)
}
 0x810   :  { %1852 = dma.vmem_to_hbm [thread:$0]  %s1848_s25, 128, %s1850_s11, [#allocation5]   ;;  %v1470_v37 = vpop.f32.mrf.mxu0  ;;  %1651 = vst [vmem:[#allocation33] sm:$0xff] %v1650_v36 }
 0x811   :  { %s3153_s8 = sshra.s32 %s1861_s19, 4  ;;  %s3157_s4 = scalar_lea.hbm %s3431_s29, 8  ;;  %s3154_s8 = int_to_ptr.hbm [resolvable:$true] %s3153_s8 }
 0x812   :  { %s3155_s13 = scalar_lea.hbm %s3154_s8, 8  ;;  %p3158_p12 = scmp.lt.s32.totalorder %s3154_s8, %s3431_s29 }
 0x813   :  { %p3156_p11 = scmp.ne.s32.totalorder %s3154_s8, %s3155_s13  ;;  %p3159_p13 = scmp.lt.s32.totalorder %s3157_s4, %s3155_s13 }
 0x815   :  { %p3160_p0 = por %p3159_p13, %p3158_p12 }
 0x817   :  { %p3161_p1 = pnand %p3160_p0, %p3156_p11 }
 0x819   :  { %3164 = shalt.err (!%p3161_p1)
}
 0x81a   :  { %1863 = dma.vmem_to_hbm [thread:$0]  %s1859_s17, 128, %s1861_s19, [#allocation34]   ;;  %v2676_v38 = vld [vmem:[%s3421_s14] ss:$0 sm:$0xff] }
 0x81b   :  { %s3267_s5 = smov [#allocation35]   ;;  %s1871_s14 = sshll.u32 %s3436_s20, 4  ;;  %s1872_s14 = int_to_ptr.hbm [resolvable:$true] %s1871_s14 }
 0x81c   :  { %s1869_s29 = sshll.u32 %s3267_s5, 4  ;;  %s3177_s6 = sshra.s32 %s1872_s14, 4  ;;  %s1870_s29 = int_to_ptr.vmem [resolvable:$true] %s1869_s29  ;;  %s3178_s6 = int_to_ptr.hbm [resolvable:$true] %s3177_s6 }
 0x81d   :  { %s3179_s9 = scalar_lea.hbm %s3178_s6, 8  ;;  %s3181_s26 = scalar_lea.hbm %s3436_s20, 8 }
 0x81e   :  { %v1818_v39 = vpop.f32.mrf.mxu0  ;;  %p3180_p2 = scmp.ne.s32.totalorder %s3178_s6, %s3179_s9  ;;  %p3182_p3 = scmp.lt.s32.totalorder %s3178_s6, %s3436_s20 }
 0x81f   :  { %v1819_v40 = vadd.f32 %v2676_v38, %v1818_v39  ;;  %p3183_p4 = scmp.lt.s32.totalorder %s3181_s26, %s3179_s9 }
 0x821   :  { %v1822_v41 = vsub.f32 0.0, %v1819_v40  ;;  %p3184_p5 = por %p3183_p4, %p3182_p3 }
 0x823   :  { %v1823_v42 = vmul.f32 1.442695, %v1822_v41  ;;  %p3185_p6 = pnand %p3184_p5, %p3180_p2 }
 0x825   :  { %2681 = vpow2.f32 %v1823_v42 }
 0x826   :  { %v1820_v44 = vpop.f32.mrf.mxu0 }
 0x82b   :  { %v2682_v45 = vpop.eup %2681 }
 0x82c   :  { %v1825_v46 = vadd.f32 1.0, %v2682_v45 }
 0x82e   :  { %2683 = vrcp.f32 %v1825_v46  ;;  %v1837_v50 = vand.u32 2147483648, %v1825_v46  ;;  %v1835_v52 = vand.u32 2147483647, %v1825_v46  ;;  %vm1831_vm10 = vweird.f32 %v1825_v46 }
 0x830   :  { %v1838_v54 = vor.u32 1.1754944e-38, %v1837_v50  ;;  %vm1836_vm12 = vcmp.eq.f32.partialorder %v1835_v52, 8.507059e+37 }
 0x834   :  { %v2684_v47 = vpop.eup %2683 }
 0x835   :  { %v1827_v48 = vmul.f32 %v2684_v47, %v1825_v46  ;;  %vm1832_vm9 = vweird.f32 %v2684_v47 }
 0x836   :  { %vm1833_vm11 = vmor %vm1831_vm10, %vm1832_vm9 }
 0x837   :  { %v1828_v49 = vsub.f32 1.0, %v1827_v48 }
 0x839   :  { %v1829_v51 = vmul.f32 %v2684_v47, %v1828_v49 }
 0x83b   :  { %v1830_v53 = vadd.f32 %v2684_v47, %v1829_v51 }
 0x83d   :  { %v1834_v55 = vsel %vm1833_vm11, %v2684_v47, %v1830_v53 }
 0x83e   :  { %v1839_v56 = vsel %vm1836_vm12, %v1838_v54, %v1834_v55 }
 0x83f   :  { %1841 = vst [vmem:[#allocation35] sm:$0xff] %v1839_v56 }
 0x840   :  { %3188 = shalt.err (!%p3185_p6)
}
 0x841   :  { %1874 = dma.vmem_to_hbm [thread:$0]  %s1870_s29, 128, %s1872_s14, [#allocation34]  }
 0x842   :  { %3209 = dma.done.wait [#allocation5], 128  }
 0x843   :  { %3210 = vsyncadd [#allocation5], 4294967168 }
 0x844   :  { %3211 = dma.done.wait [#allocation34], 256  }
 0x845   :  { %3212 = vsyncadd [#allocation34], 4294967040 }
 0x846   :  { %1887 = vsyncpa [#allocation4], 1 }
 0x847   :  { %1888 = vsyncpa [#allocation7], 1 }
 0x848   :  { %1889 = vsyncpa [#allocation10], 1 }
 0x849   :  { %1890 = vsyncpa [#allocation13], 1 }
 0x84a   :  { %1891 = vsyncpa [#allocation16], 1 }
 0x84b   :  { %1892 = vsyncpa [#allocation19], 1 }
 0x84c   :  { %1893 = vsyncpa [#allocation22], 1 }
 0x84d   :  { %1894 = vsyncpa [#allocation25], 1 }
 0x84e   :  { %1895 = vsyncpa [#allocation28], 1 }
 0x84f   :  { %1896 = vsyncpa [#allocation31], 1 }
 0x850   :  { %1897 = vsyncpa [#allocation5], 1 }
 0x851   :  { %1898 = vsyncpa [#allocation34], 1 }

</bundles_post_ra>
